<compile_context>
chip_gen: v7x
topology: tpu7x:2x2x1
jax: 0.10.0
libtpu: 0.0.40
codegen_flags: <defaults>
</compile_context>

<pallas_src>
import functools

import jax
import jax.numpy as jnp
import numpy as np
from jax import lax
from jax.experimental import pallas as pl
from jax.experimental.pallas import tpu as pltpu


# ----------------------------------------------------------------------------
# Fused MBConv kernel: expand -> depthwise -> project (+ residual)
# ----------------------------------------------------------------------------
def _mbconv_fused_kernel(*refs, k, stride, p, H, W, Tr, Wout, hidden,
                         expand, use_residual):
    if use_residual:
        (x_ref, we_ref, be_ref, wd_ref, bd_ref, wp_ref, bp_ref,
         res_ref, o_ref, h_s) = refs
    else:
        (x_ref, we_ref, be_ref, wd_ref, bd_ref, wp_ref, bp_ref,
         o_ref, h_s) = refs
        res_ref = None

    rb = pl.program_id(1)
    Tin = (Tr - 1) * stride + k          # padded input rows needed per block
    cin = x_ref.shape[-1]

    # ---- Stage 1: expand 1x1 conv (+BN+ReLU6) into VMEM scratch, padded ----
    if p > 0:
        h_s[...] = jnp.zeros(h_s.shape, jnp.float32)   # zero pad columns/rows

    if expand:
        we = we_ref[...].astype(jnp.float32)           # (cin, hidden), scale-folded
        be = be_ref[...].astype(jnp.float32)           # (1, hidden)

    row0 = rb * (Tr * stride)                          # first padded row needed
    for j in range(Tin):
        r = row0 + j - p                               # unpadded input row
        valid = jnp.logical_and(r >= 0, r < H).astype(jnp.float32)
        src = jnp.clip(r, 0, H - 1)
        xrow = x_ref[0, pl.ds(src, 1), :, :].reshape(W, cin).astype(jnp.float32)
        if expand:
            hrow = jnp.dot(xrow, we, preferred_element_type=jnp.float32)
            hrow = jnp.clip(hrow + be, 0.0, 6.0)
        else:
            hrow = xrow
        h_s[j, p:p + W, :] = hrow * valid              # halo rows -> zeros

    # ---- Stage 2: depthwise kxk conv (+BN+ReLU6) ----
    wd = wd_ref[...].astype(jnp.float32)               # (k, k, hidden), scale-folded
    bd = bd_ref[...].reshape(1, 1, hidden).astype(jnp.float32)
    acc = jnp.zeros((Tr, Wout, hidden), jnp.float32)
    for kh in range(k):
        for kw in range(k):
            if stride == 1:
                patch = h_s[kh:kh + Tr, kw:kw + Wout, :]
            else:
                patch = h_s[pl.ds(kh, Tr, stride=stride),
                            pl.ds(kw, Wout, stride=stride), :]
            acc = acc + patch * wd[kh, kw, :]
    y = jnp.clip(acc + bd, 0.0, 6.0)

    # ---- Stage 3: project 1x1 conv (+BN) + residual, channel-major output ----
    a2 = y.reshape(Tr * Wout, hidden)
    wp = wp_ref[...].astype(jnp.float32)               # (cout, hidden), scale-folded
    out = lax.dot_general(wp, a2, (((1,), (1,)), ((), ())),
                          preferred_element_type=jnp.float32)   # (cout, Tr*Wout)
    out = out + bp_ref[...].astype(jnp.float32)                 # (cout, 1)
    if use_residual:
        out = out + res_ref[0].astype(jnp.float32)
    o_ref[0] = out.astype(o_ref.dtype)


# ----------------------------------------------------------------------------
# Wrapper
# ----------------------------------------------------------------------------
def _pick_row_tile(Ho, Wo):
    """Smallest divisor of Ho (preferring >= 8 rows) whose flattened block
    width Tr*Wo is lane-aligned (multiple of 128); otherwise the whole image
    (block == full array dims is always a legal BlockSpec)."""
    cands = [t for t in range(1, Ho + 1)
             if Ho % t == 0 and (t * Wo) % 128 == 0]
    big = [t for t in cands if t >= 8]
    if big:
        return min(big)
    if cands:
        return max(cands)
    return Ho


def mbconv_forward(x_nchw, params, *, kernel_size, stride, expand_ratio):
    N, Cin, H, W = x_nchw.shape
    k = kernel_size
    p = (k - 1) // 2
    Ho = (H + 2 * p - k) // stride + 1
    Wo = (W + 2 * p - k) // stride + 1
    hidden = Cin * expand_ratio
    cout = params["proj_w"].shape[1]
    expand = expand_ratio != 1
    use_residual = (stride == 1 and Cin == cout)

    # Channels-last view of the input for the conv chain (channels on lanes).
    x_nhwc = jnp.transpose(x_nchw, (0, 2, 3, 1))

    # Fold BN scale into conv weights; kernel only adds the shift.
    if expand:
        w_exp = params["expand_w"] * params["expand_scale"][None, :]
        b_exp = params["expand_shift"].reshape(1, hidden)
    else:
        w_exp = jnp.zeros((Cin, hidden), jnp.float32)       # unused
        b_exp = jnp.zeros((1, hidden), jnp.float32)         # unused
    w_dw = params["dw_w"] * params["dw_scale"][None, None, :]
    b_dw = params["dw_shift"].reshape(1, hidden)
    w_prj = (params["proj_w"] * params["proj_scale"][None, :]).T   # (cout, hidden)
    b_prj = params["proj_shift"].reshape(cout, 1)

    Tr = _pick_row_tile(Ho, Wo)
    Tin = (Tr - 1) * stride + k
    Wp = W + 2 * p
    grid = (N, Ho // Tr)

    kern = functools.partial(
        _mbconv_fused_kernel, k=k, stride=stride, p=p, H=H, W=W, Tr=Tr,
        Wout=Wo, hidden=hidden, expand=expand, use_residual=use_residual)

    in_specs = [
        pl.BlockSpec((1, H, W, Cin), lambda n, r: (n, 0, 0, 0)),
        pl.BlockSpec((Cin, hidden), lambda n, r: (0, 0)),
        pl.BlockSpec((1, hidden), lambda n, r: (0, 0)),
        pl.BlockSpec((k, k, hidden), lambda n, r: (0, 0, 0)),
        pl.BlockSpec((1, hidden), lambda n, r: (0, 0)),
        pl.BlockSpec((cout, hidden), lambda n, r: (0, 0)),
        pl.BlockSpec((cout, 1), lambda n, r: (0, 0)),
    ]
    args = [x_nhwc, w_exp, b_exp, w_dw, b_dw, w_prj, b_prj]
    if use_residual:
        in_specs.append(pl.BlockSpec((1, Cin, Tr * W), lambda n, r: (n, 0, r)))
        args.append(x_nchw.reshape(N, Cin, H * W))

    out_flat = pl.pallas_call(
        kern,
        out_shape=jax.ShapeDtypeStruct((N, cout, Ho * Wo), x_nchw.dtype),
        grid=grid,
        in_specs=in_specs,
        out_specs=pl.BlockSpec((1, cout, Tr * Wo), lambda n, r: (n, 0, r)),
        scratch_shapes=[pltpu.VMEM((Tin, Wp, hidden), jnp.float32)],
        compiler_params=pltpu.CompilerParams(
            dimension_semantics=("parallel", "parallel"),
            vmem_limit_bytes=64 * 1024 * 1024),
    )(*args)
    return out_flat.reshape(N, cout, Ho, Wo)


# ----------------------------------------------------------------------------
# Deterministic parameter init + BN folding
# ----------------------------------------------------------------------------
def _fold_bn(key, c, eps=1e-5):
    k1, k2, k3, k4 = jax.random.split(key, 4)
    gamma = jax.random.uniform(k1, (c,), jnp.float32, 0.5, 1.5)
    beta = 0.1 * jax.random.normal(k2, (c,), jnp.float32)
    mean = 0.1 * jax.random.normal(k3, (c,), jnp.float32)
    var = jax.random.uniform(k4, (c,), jnp.float32, 0.5, 1.5)
    scale = gamma / jnp.sqrt(var + eps)
    shift = beta - mean * scale
    return scale, shift


def make_params(key, in_channels, out_channels, kernel_size, expand_ratio):
    hidden = in_channels * expand_ratio
    keys = jax.random.split(key, 6)
    params = {}
    params["expand_w"] = 0.2 * jax.random.normal(
        keys[0], (in_channels, hidden), jnp.float32)
    params["expand_scale"], params["expand_shift"] = _fold_bn(keys[1], hidden)
    params["dw_w"] = 0.2 * jax.random.normal(
        keys[2], (kernel_size, kernel_size, hidden), jnp.float32)
    params["dw_scale"], params["dw_shift"] = _fold_bn(keys[3], hidden)
    params["proj_w"] = 0.2 * jax.random.normal(
        keys[4], (hidden, out_channels), jnp.float32)
    params["proj_scale"], params["proj_shift"] = _fold_bn(keys[5], out_channels)
    return params


# ----------------------------------------------------------------------------
# Pure-JAX reference (NCHW, mirrors the PyTorch module in eval mode)
# ----------------------------------------------------------------------------
def ref_forward(x, params, *, kernel_size, stride, expand_ratio):
    identity = x
    cin = x.shape[1]
    if expand_ratio != 1:
        w4 = params["expand_w"].T[:, :, None, None]  # OIHW
        x = lax.conv_general_dilated(x, w4, (1, 1), "VALID",
                                     dimension_numbers=("NCHW", "OIHW", "NCHW"))
        x = x * params["expand_scale"][None, :, None, None] \
            + params["expand_shift"][None, :, None, None]
        x = jnp.clip(x, 0.0, 6.0)
    C = x.shape[1]
    wdw = jnp.transpose(params["dw_w"], (2, 0, 1))[:, None, :, :]  # (C,1,k,k)
    p = (kernel_size - 1) // 2
    x = lax.conv_general_dilated(x, wdw, (stride, stride), ((p, p), (p, p)),
                                 dimension_numbers=("NCHW", "OIHW", "NCHW"),
                                 feature_group_count=C)
    x = x * params["dw_scale"][None, :, None, None] \
        + params["dw_shift"][None, :, None, None]
    x = jnp.clip(x, 0.0, 6.0)
    wp4 = params["proj_w"].T[:, :, None, None]
    x = lax.conv_general_dilated(x, wp4, (1, 1), "VALID",
                                 dimension_numbers=("NCHW", "OIHW", "NCHW"))
    x = x * params["proj_scale"][None, :, None, None] \
        + params["proj_shift"][None, :, None, None]
    cout = params["proj_w"].shape[1]
    if stride == 1 and cin == cout:
        x = x + identity
    return x


if __name__ == "__main__":
    # Small MBConv config: in=4, out=4, k=3, stride=1, expand_ratio=6 -> hidden=24
    in_channels, out_channels = 4, 4
    kernel_size, stride, expand_ratio = 3, 1, 6
    N, H, W = 2, 16, 16

    key = jax.random.PRNGKey(0)
    kx, kp = jax.random.split(key)
    x = jax.random.normal(kx, (N, in_channels, H, W), jnp.float32)
    params = make_params(kp, in_channels, out_channels, kernel_size, expand_ratio)

    fwd = jax.jit(functools.partial(mbconv_forward, kernel_size=kernel_size,
                                    stride=stride, expand_ratio=expand_ratio))
    out = jax.block_until_ready(fwd(x, params))

    ref = jax.block_until_ready(
        ref_forward(x, params, kernel_size=kernel_size, stride=stride,
                    expand_ratio=expand_ratio))

    assert out.shape == (N, out_channels, H, W), out.shape
    np.testing.assert_allclose(np.asarray(out), np.asarray(ref),
                               rtol=1e-4, atol=1e-4)
    print("KERNEL_OK")
</pallas_src>

<mosaic_0001>
module attributes {stable_mosaic.version = 11 : i64} {
  func.func @_mbconv_fused_kernel(%arg0: i32, %arg1: i32, %arg2: memref<1x16x16x4xf32, #tpu.memory_space<vmem>>, %arg3: memref<4x24xf32, #tpu.memory_space<vmem>>, %arg4: memref<1x24xf32, #tpu.memory_space<vmem>>, %arg5: memref<3x3x24xf32, #tpu.memory_space<vmem>>, %arg6: memref<1x24xf32, #tpu.memory_space<vmem>>, %arg7: memref<4x24xf32, #tpu.memory_space<vmem>>, %arg8: memref<4x1xf32, #tpu.memory_space<vmem>>, %arg9: memref<1x4x128xf32, #tpu.memory_space<vmem>>, %arg10: memref<1x4x128xf32, #tpu.memory_space<vmem>>, %arg11: memref<10x18x24xf32, #tpu.memory_space<vmem>>) attributes {dimension_semantics = [#tpu.dimension_semantics<parallel>, #tpu.dimension_semantics<parallel>], iteration_bounds = array<i64: 2, 2>, scalar_prefetch = 0 : i64, scratch_operands = 1 : i64, tpu.core_type = #tpu.core_type<tc>, window_params = [{transform_indices = @transform_0, window_bounds = array<i64: 1, 16, 16, 4>}, {pipeline_mode = #tpu.pipeline_mode<synchronous>, transform_indices = @transform_1, window_bounds = array<i64: 4, 24>}, {pipeline_mode = #tpu.pipeline_mode<synchronous>, transform_indices = @transform_2, window_bounds = array<i64: 1, 24>}, {pipeline_mode = #tpu.pipeline_mode<synchronous>, transform_indices = @transform_3, window_bounds = array<i64: 3, 3, 24>}, {pipeline_mode = #tpu.pipeline_mode<synchronous>, transform_indices = @transform_4, window_bounds = array<i64: 1, 24>}, {pipeline_mode = #tpu.pipeline_mode<synchronous>, transform_indices = @transform_5, window_bounds = array<i64: 4, 24>}, {pipeline_mode = #tpu.pipeline_mode<synchronous>, transform_indices = @transform_6, window_bounds = array<i64: 4, 1>}, {transform_indices = @transform_7, window_bounds = array<i64: 1, 4, 128>}, {transform_indices = @transform_8, window_bounds = array<i64: 1, 4, 128>}]} {
    %cst = arith.constant 0.000000e+00 : f32
    %0 = vector.broadcast %cst : f32 to vector<10x18x24xf32>
    %c0 = arith.constant 0 : index
    %c0_0 = arith.constant 0 : index
    %c0_1 = arith.constant 0 : index
    %1 = vector.load %arg11[%c0, %c0_0, %c0_1] : memref<10x18x24xf32, #tpu.memory_space<vmem>>, vector<10x18x24xf32>
    tpu.vector_store %arg11[%c0, %c0_0, %c0_1], %0 {strides = array<i32>} : memref<10x18x24xf32, #tpu.memory_space<vmem>>, vector<10x18x24xf32>,
    %c0_2 = arith.constant 0 : index
    %c0_3 = arith.constant 0 : index
    %2 = vector.load %arg3[%c0_2, %c0_3] : memref<4x24xf32, #tpu.memory_space<vmem>>, vector<4x24xf32>
    %c0_4 = arith.constant 0 : index
    %c0_5 = arith.constant 0 : index
    %3 = vector.load %arg4[%c0_4, %c0_5] : memref<1x24xf32, #tpu.memory_space<vmem>>, vector<1x24xf32>
    %c8_i32 = arith.constant 8 : i32
    %4 = arith.muli %arg1, %c8_i32 : i32
    %c0_i32 = arith.constant 0 : i32
    %5 = arith.addi %4, %c0_i32 : i32
    %c1_i32 = arith.constant 1 : i32
    %6 = arith.subi %5, %c1_i32 : i32
    %c0_i32_6 = arith.constant 0 : i32
    %7 = arith.cmpi sge, %6, %c0_i32_6 : i32
    %c16_i32 = arith.constant 16 : i32
    %8 = arith.cmpi slt, %6, %c16_i32 : i32
    %9 = arith.andi %7, %8 : i1
    %10 = arith.extui %9 : i1 to i32
    %11 = arith.sitofp %10 : i32 to f32
    %c0_i32_7 = arith.constant 0 : i32
    %c15_i32 = arith.constant 15 : i32
    %12 = arith.maxsi %c0_i32_7, %6 : i32
    %13 = arith.minsi %c15_i32, %12 : i32
    %c0_8 = arith.constant 0 : index
    %14 = arith.index_cast %13 : i32 to index
    %c0_9 = arith.constant 0 : index
    %c0_10 = arith.constant 0 : index
    %15 = vector.load %arg2[%c0_8, %14, %c0_9, %c0_10] : memref<1x16x16x4xf32, #tpu.memory_space<vmem>>, vector<1x1x16x4xf32>
    %16 = vector.shape_cast %15 : vector<1x1x16x4xf32> to vector<1x16x4xf32>
    %17 = vector.shape_cast %16 : vector<1x16x4xf32> to vector<16x4xf32>
    %cst_11 = arith.constant dense<0.000000e+00> : vector<16x24xf32>
    %18 = tpu.matmul %17, %2, %cst_11 {dimension_numbers = #tpu.dot_dimension_numbers<[1], [0], [0], [1], [0, 0, 1, 1], [], []>} : vector<16x4xf32>, vector<4x24xf32>, vector<16x24xf32> -> vector<16x24xf32>
    %19 = vector.broadcast %3 : vector<1x24xf32> to vector<16x24xf32>
    %20 = arith.addf %18, %19 : vector<16x24xf32>
    %cst_12 = arith.constant 0.000000e+00 : f32
    %cst_13 = arith.constant 6.000000e+00 : f32
    %21 = vector.broadcast %cst_12 : f32 to vector<16x24xf32>
    %22 = arith.maximumf %21, %20 : vector<16x24xf32>
    %23 = vector.broadcast %cst_13 : f32 to vector<16x24xf32>
    %24 = arith.minimumf %23, %22 : vector<16x24xf32>
    %25 = vector.broadcast %11 : f32 to vector<16x24xf32>
    %26 = arith.mulf %24, %25 : vector<16x24xf32>
    %c0_14 = arith.constant 0 : index
    %c1 = arith.constant 1 : index
    %c0_15 = arith.constant 0 : index
    %27 = vector.load %arg11[%c0_14, %c1, %c0_15] : memref<10x18x24xf32, #tpu.memory_space<vmem>>, vector<1x16x24xf32>
    %28 = vector.shape_cast %27 : vector<1x16x24xf32> to vector<16x24xf32>
    %29 = vector.shape_cast %26 : vector<16x24xf32> to vector<1x16x24xf32>
    tpu.vector_store %arg11[%c0_14, %c1, %c0_15], %29 {strides = array<i32>} : memref<10x18x24xf32, #tpu.memory_space<vmem>>, vector<1x16x24xf32>,
    %c1_i32_16 = arith.constant 1 : i32
    %30 = arith.addi %4, %c1_i32_16 : i32
    %c1_i32_17 = arith.constant 1 : i32
    %31 = arith.subi %30, %c1_i32_17 : i32
    %c0_i32_18 = arith.constant 0 : i32
    %32 = arith.cmpi sge, %31, %c0_i32_18 : i32
    %c16_i32_19 = arith.constant 16 : i32
    %33 = arith.cmpi slt, %31, %c16_i32_19 : i32
    %34 = arith.andi %32, %33 : i1
    %35 = arith.extui %34 : i1 to i32
    %36 = arith.sitofp %35 : i32 to f32
    %c0_i32_20 = arith.constant 0 : i32
    %c15_i32_21 = arith.constant 15 : i32
    %37 = arith.maxsi %c0_i32_20, %31 : i32
    %38 = arith.minsi %c15_i32_21, %37 : i32
    %c0_22 = arith.constant 0 : index
    %39 = arith.index_cast %38 : i32 to index
    %c0_23 = arith.constant 0 : index
    %c0_24 = arith.constant 0 : index
    %40 = vector.load %arg2[%c0_22, %39, %c0_23, %c0_24] : memref<1x16x16x4xf32, #tpu.memory_space<vmem>>, vector<1x1x16x4xf32>
    %41 = vector.shape_cast %40 : vector<1x1x16x4xf32> to vector<1x16x4xf32>
    %42 = vector.shape_cast %41 : vector<1x16x4xf32> to vector<16x4xf32>
    %cst_25 = arith.constant dense<0.000000e+00> : vector<16x24xf32>
    %43 = tpu.matmul %42, %2, %cst_25 {dimension_numbers = #tpu.dot_dimension_numbers<[1], [0], [0], [1], [0, 0, 1, 1], [], []>} : vector<16x4xf32>, vector<4x24xf32>, vector<16x24xf32> -> vector<16x24xf32>
    %44 = vector.broadcast %3 : vector<1x24xf32> to vector<16x24xf32>
    %45 = arith.addf %43, %44 : vector<16x24xf32>
    %cst_26 = arith.constant 0.000000e+00 : f32
    %cst_27 = arith.constant 6.000000e+00 : f32
    %46 = vector.broadcast %cst_26 : f32 to vector<16x24xf32>
    %47 = arith.maximumf %46, %45 : vector<16x24xf32>
    %48 = vector.broadcast %cst_27 : f32 to vector<16x24xf32>
    %49 = arith.minimumf %48, %47 : vector<16x24xf32>
    %50 = vector.broadcast %36 : f32 to vector<16x24xf32>
    %51 = arith.mulf %49, %50 : vector<16x24xf32>
    %c1_28 = arith.constant 1 : index
    %c1_29 = arith.constant 1 : index
    %c0_30 = arith.constant 0 : index
    %52 = vector.load %arg11[%c1_28, %c1_29, %c0_30] : memref<10x18x24xf32, #tpu.memory_space<vmem>>, vector<1x16x24xf32>
    %53 = vector.shape_cast %52 : vector<1x16x24xf32> to vector<16x24xf32>
    %54 = vector.shape_cast %51 : vector<16x24xf32> to vector<1x16x24xf32>
    tpu.vector_store %arg11[%c1_28, %c1_29, %c0_30], %54 {strides = array<i32>} : memref<10x18x24xf32, #tpu.memory_space<vmem>>, vector<1x16x24xf32>,
    %c2_i32 = arith.constant 2 : i32
    %55 = arith.addi %4, %c2_i32 : i32
    %c1_i32_31 = arith.constant 1 : i32
    %56 = arith.subi %55, %c1_i32_31 : i32
    %c0_i32_32 = arith.constant 0 : i32
    %57 = arith.cmpi sge, %56, %c0_i32_32 : i32
    %c16_i32_33 = arith.constant 16 : i32
    %58 = arith.cmpi slt, %56, %c16_i32_33 : i32
    %59 = arith.andi %57, %58 : i1
    %60 = arith.extui %59 : i1 to i32
    %61 = arith.sitofp %60 : i32 to f32
    %c0_i32_34 = arith.constant 0 : i32
    %c15_i32_35 = arith.constant 15 : i32
    %62 = arith.maxsi %c0_i32_34, %56 : i32
    %63 = arith.minsi %c15_i32_35, %62 : i32
    %c0_36 = arith.constant 0 : index
    %64 = arith.index_cast %63 : i32 to index
    %c0_37 = arith.constant 0 : index
    %c0_38 = arith.constant 0 : index
    %65 = vector.load %arg2[%c0_36, %64, %c0_37, %c0_38] : memref<1x16x16x4xf32, #tpu.memory_space<vmem>>, vector<1x1x16x4xf32>
    %66 = vector.shape_cast %65 : vector<1x1x16x4xf32> to vector<1x16x4xf32>
    %67 = vector.shape_cast %66 : vector<1x16x4xf32> to vector<16x4xf32>
    %cst_39 = arith.constant dense<0.000000e+00> : vector<16x24xf32>
    %68 = tpu.matmul %67, %2, %cst_39 {dimension_numbers = #tpu.dot_dimension_numbers<[1], [0], [0], [1], [0, 0, 1, 1], [], []>} : vector<16x4xf32>, vector<4x24xf32>, vector<16x24xf32> -> vector<16x24xf32>
    %69 = vector.broadcast %3 : vector<1x24xf32> to vector<16x24xf32>
    %70 = arith.addf %68, %69 : vector<16x24xf32>
    %cst_40 = arith.constant 0.000000e+00 : f32
    %cst_41 = arith.constant 6.000000e+00 : f32
    %71 = vector.broadcast %cst_40 : f32 to vector<16x24xf32>
    %72 = arith.maximumf %71, %70 : vector<16x24xf32>
    %73 = vector.broadcast %cst_41 : f32 to vector<16x24xf32>
    %74 = arith.minimumf %73, %72 : vector<16x24xf32>
    %75 = vector.broadcast %61 : f32 to vector<16x24xf32>
    %76 = arith.mulf %74, %75 : vector<16x24xf32>
    %c2 = arith.constant 2 : index
    %c1_42 = arith.constant 1 : index
    %c0_43 = arith.constant 0 : index
    %77 = vector.load %arg11[%c2, %c1_42, %c0_43] : memref<10x18x24xf32, #tpu.memory_space<vmem>>, vector<1x16x24xf32>
    %78 = vector.shape_cast %77 : vector<1x16x24xf32> to vector<16x24xf32>
    %79 = vector.shape_cast %76 : vector<16x24xf32> to vector<1x16x24xf32>
    tpu.vector_store %arg11[%c2, %c1_42, %c0_43], %79 {strides = array<i32>} : memref<10x18x24xf32, #tpu.memory_space<vmem>>, vector<1x16x24xf32>,
    %c3_i32 = arith.constant 3 : i32
    %80 = arith.addi %4, %c3_i32 : i32
    %c1_i32_44 = arith.constant 1 : i32
    %81 = arith.subi %80, %c1_i32_44 : i32
    %c0_i32_45 = arith.constant 0 : i32
    %82 = arith.cmpi sge, %81, %c0_i32_45 : i32
    %c16_i32_46 = arith.constant 16 : i32
    %83 = arith.cmpi slt, %81, %c16_i32_46 : i32
    %84 = arith.andi %82, %83 : i1
    %85 = arith.extui %84 : i1 to i32
    %86 = arith.sitofp %85 : i32 to f32
    %c0_i32_47 = arith.constant 0 : i32
    %c15_i32_48 = arith.constant 15 : i32
    %87 = arith.maxsi %c0_i32_47, %81 : i32
    %88 = arith.minsi %c15_i32_48, %87 : i32
    %c0_49 = arith.constant 0 : index
    %89 = arith.index_cast %88 : i32 to index
    %c0_50 = arith.constant 0 : index
    %c0_51 = arith.constant 0 : index
    %90 = vector.load %arg2[%c0_49, %89, %c0_50, %c0_51] : memref<1x16x16x4xf32, #tpu.memory_space<vmem>>, vector<1x1x16x4xf32>
    %91 = vector.shape_cast %90 : vector<1x1x16x4xf32> to vector<1x16x4xf32>
    %92 = vector.shape_cast %91 : vector<1x16x4xf32> to vector<16x4xf32>
    %cst_52 = arith.constant dense<0.000000e+00> : vector<16x24xf32>
    %93 = tpu.matmul %92, %2, %cst_52 {dimension_numbers = #tpu.dot_dimension_numbers<[1], [0], [0], [1], [0, 0, 1, 1], [], []>} : vector<16x4xf32>, vector<4x24xf32>, vector<16x24xf32> -> vector<16x24xf32>
    %94 = vector.broadcast %3 : vector<1x24xf32> to vector<16x24xf32>
    %95 = arith.addf %93, %94 : vector<16x24xf32>
    %cst_53 = arith.constant 0.000000e+00 : f32
    %cst_54 = arith.constant 6.000000e+00 : f32
    %96 = vector.broadcast %cst_53 : f32 to vector<16x24xf32>
    %97 = arith.maximumf %96, %95 : vector<16x24xf32>
    %98 = vector.broadcast %cst_54 : f32 to vector<16x24xf32>
    %99 = arith.minimumf %98, %97 : vector<16x24xf32>
    %100 = vector.broadcast %86 : f32 to vector<16x24xf32>
    %101 = arith.mulf %99, %100 : vector<16x24xf32>
    %c3 = arith.constant 3 : index
    %c1_55 = arith.constant 1 : index
    %c0_56 = arith.constant 0 : index
    %102 = vector.load %arg11[%c3, %c1_55, %c0_56] : memref<10x18x24xf32, #tpu.memory_space<vmem>>, vector<1x16x24xf32>
    %103 = vector.shape_cast %102 : vector<1x16x24xf32> to vector<16x24xf32>
    %104 = vector.shape_cast %101 : vector<16x24xf32> to vector<1x16x24xf32>
    tpu.vector_store %arg11[%c3, %c1_55, %c0_56], %104 {strides = array<i32>} : memref<10x18x24xf32, #tpu.memory_space<vmem>>, vector<1x16x24xf32>,
    %c4_i32 = arith.constant 4 : i32
    %105 = arith.addi %4, %c4_i32 : i32
    %c1_i32_57 = arith.constant 1 : i32
    %106 = arith.subi %105, %c1_i32_57 : i32
    %c0_i32_58 = arith.constant 0 : i32
    %107 = arith.cmpi sge, %106, %c0_i32_58 : i32
    %c16_i32_59 = arith.constant 16 : i32
    %108 = arith.cmpi slt, %106, %c16_i32_59 : i32
    %109 = arith.andi %107, %108 : i1
    %110 = arith.extui %109 : i1 to i32
    %111 = arith.sitofp %110 : i32 to f32
    %c0_i32_60 = arith.constant 0 : i32
    %c15_i32_61 = arith.constant 15 : i32
    %112 = arith.maxsi %c0_i32_60, %106 : i32
    %113 = arith.minsi %c15_i32_61, %112 : i32
    %c0_62 = arith.constant 0 : index
    %114 = arith.index_cast %113 : i32 to index
    %c0_63 = arith.constant 0 : index
    %c0_64 = arith.constant 0 : index
    %115 = vector.load %arg2[%c0_62, %114, %c0_63, %c0_64] : memref<1x16x16x4xf32, #tpu.memory_space<vmem>>, vector<1x1x16x4xf32>
    %116 = vector.shape_cast %115 : vector<1x1x16x4xf32> to vector<1x16x4xf32>
    %117 = vector.shape_cast %116 : vector<1x16x4xf32> to vector<16x4xf32>
    %cst_65 = arith.constant dense<0.000000e+00> : vector<16x24xf32>
    %118 = tpu.matmul %117, %2, %cst_65 {dimension_numbers = #tpu.dot_dimension_numbers<[1], [0], [0], [1], [0, 0, 1, 1], [], []>} : vector<16x4xf32>, vector<4x24xf32>, vector<16x24xf32> -> vector<16x24xf32>
    %119 = vector.broadcast %3 : vector<1x24xf32> to vector<16x24xf32>
    %120 = arith.addf %118, %119 : vector<16x24xf32>
    %cst_66 = arith.constant 0.000000e+00 : f32
    %cst_67 = arith.constant 6.000000e+00 : f32
    %121 = vector.broadcast %cst_66 : f32 to vector<16x24xf32>
    %122 = arith.maximumf %121, %120 : vector<16x24xf32>
    %123 = vector.broadcast %cst_67 : f32 to vector<16x24xf32>
    %124 = arith.minimumf %123, %122 : vector<16x24xf32>
    %125 = vector.broadcast %111 : f32 to vector<16x24xf32>
    %126 = arith.mulf %124, %125 : vector<16x24xf32>
    %c4 = arith.constant 4 : index
    %c1_68 = arith.constant 1 : index
    %c0_69 = arith.constant 0 : index
    %127 = vector.load %arg11[%c4, %c1_68, %c0_69] : memref<10x18x24xf32, #tpu.memory_space<vmem>>, vector<1x16x24xf32>
    %128 = vector.shape_cast %127 : vector<1x16x24xf32> to vector<16x24xf32>
    %129 = vector.shape_cast %126 : vector<16x24xf32> to vector<1x16x24xf32>
    tpu.vector_store %arg11[%c4, %c1_68, %c0_69], %129 {strides = array<i32>} : memref<10x18x24xf32, #tpu.memory_space<vmem>>, vector<1x16x24xf32>,
    %c5_i32 = arith.constant 5 : i32
    %130 = arith.addi %4, %c5_i32 : i32
    %c1_i32_70 = arith.constant 1 : i32
    %131 = arith.subi %130, %c1_i32_70 : i32
    %c0_i32_71 = arith.constant 0 : i32
    %132 = arith.cmpi sge, %131, %c0_i32_71 : i32
    %c16_i32_72 = arith.constant 16 : i32
    %133 = arith.cmpi slt, %131, %c16_i32_72 : i32
    %134 = arith.andi %132, %133 : i1
    %135 = arith.extui %134 : i1 to i32
    %136 = arith.sitofp %135 : i32 to f32
    %c0_i32_73 = arith.constant 0 : i32
    %c15_i32_74 = arith.constant 15 : i32
    %137 = arith.maxsi %c0_i32_73, %131 : i32
    %138 = arith.minsi %c15_i32_74, %137 : i32
    %c0_75 = arith.constant 0 : index
    %139 = arith.index_cast %138 : i32 to index
    %c0_76 = arith.constant 0 : index
    %c0_77 = arith.constant 0 : index
    %140 = vector.load %arg2[%c0_75, %139, %c0_76, %c0_77] : memref<1x16x16x4xf32, #tpu.memory_space<vmem>>, vector<1x1x16x4xf32>
    %141 = vector.shape_cast %140 : vector<1x1x16x4xf32> to vector<1x16x4xf32>
    %142 = vector.shape_cast %141 : vector<1x16x4xf32> to vector<16x4xf32>
    %cst_78 = arith.constant dense<0.000000e+00> : vector<16x24xf32>
    %143 = tpu.matmul %142, %2, %cst_78 {dimension_numbers = #tpu.dot_dimension_numbers<[1], [0], [0], [1], [0, 0, 1, 1], [], []>} : vector<16x4xf32>, vector<4x24xf32>, vector<16x24xf32> -> vector<16x24xf32>
    %144 = vector.broadcast %3 : vector<1x24xf32> to vector<16x24xf32>
    %145 = arith.addf %143, %144 : vector<16x24xf32>
    %cst_79 = arith.constant 0.000000e+00 : f32
    %cst_80 = arith.constant 6.000000e+00 : f32
    %146 = vector.broadcast %cst_79 : f32 to vector<16x24xf32>
    %147 = arith.maximumf %146, %145 : vector<16x24xf32>
    %148 = vector.broadcast %cst_80 : f32 to vector<16x24xf32>
    %149 = arith.minimumf %148, %147 : vector<16x24xf32>
    %150 = vector.broadcast %136 : f32 to vector<16x24xf32>
    %151 = arith.mulf %149, %150 : vector<16x24xf32>
    %c5 = arith.constant 5 : index
    %c1_81 = arith.constant 1 : index
    %c0_82 = arith.constant 0 : index
    %152 = vector.load %arg11[%c5, %c1_81, %c0_82] : memref<10x18x24xf32, #tpu.memory_space<vmem>>, vector<1x16x24xf32>
    %153 = vector.shape_cast %152 : vector<1x16x24xf32> to vector<16x24xf32>
    %154 = vector.shape_cast %151 : vector<16x24xf32> to vector<1x16x24xf32>
    tpu.vector_store %arg11[%c5, %c1_81, %c0_82], %154 {strides = array<i32>} : memref<10x18x24xf32, #tpu.memory_space<vmem>>, vector<1x16x24xf32>,
    %c6_i32 = arith.constant 6 : i32
    %155 = arith.addi %4, %c6_i32 : i32
    %c1_i32_83 = arith.constant 1 : i32
    %156 = arith.subi %155, %c1_i32_83 : i32
    %c0_i32_84 = arith.constant 0 : i32
    %157 = arith.cmpi sge, %156, %c0_i32_84 : i32
    %c16_i32_85 = arith.constant 16 : i32
    %158 = arith.cmpi slt, %156, %c16_i32_85 : i32
    %159 = arith.andi %157, %158 : i1
    %160 = arith.extui %159 : i1 to i32
    %161 = arith.sitofp %160 : i32 to f32
    %c0_i32_86 = arith.constant 0 : i32
    %c15_i32_87 = arith.constant 15 : i32
    %162 = arith.maxsi %c0_i32_86, %156 : i32
    %163 = arith.minsi %c15_i32_87, %162 : i32
    %c0_88 = arith.constant 0 : index
    %164 = arith.index_cast %163 : i32 to index
    %c0_89 = arith.constant 0 : index
    %c0_90 = arith.constant 0 : index
    %165 = vector.load %arg2[%c0_88, %164, %c0_89, %c0_90] : memref<1x16x16x4xf32, #tpu.memory_space<vmem>>, vector<1x1x16x4xf32>
    %166 = vector.shape_cast %165 : vector<1x1x16x4xf32> to vector<1x16x4xf32>
    %167 = vector.shape_cast %166 : vector<1x16x4xf32> to vector<16x4xf32>
    %cst_91 = arith.constant dense<0.000000e+00> : vector<16x24xf32>
    %168 = tpu.matmul %167, %2, %cst_91 {dimension_numbers = #tpu.dot_dimension_numbers<[1], [0], [0], [1], [0, 0, 1, 1], [], []>} : vector<16x4xf32>, vector<4x24xf32>, vector<16x24xf32> -> vector<16x24xf32>
    %169 = vector.broadcast %3 : vector<1x24xf32> to vector<16x24xf32>
    %170 = arith.addf %168, %169 : vector<16x24xf32>
    %cst_92 = arith.constant 0.000000e+00 : f32
    %cst_93 = arith.constant 6.000000e+00 : f32
    %171 = vector.broadcast %cst_92 : f32 to vector<16x24xf32>
    %172 = arith.maximumf %171, %170 : vector<16x24xf32>
    %173 = vector.broadcast %cst_93 : f32 to vector<16x24xf32>
    %174 = arith.minimumf %173, %172 : vector<16x24xf32>
    %175 = vector.broadcast %161 : f32 to vector<16x24xf32>
    %176 = arith.mulf %174, %175 : vector<16x24xf32>
    %c6 = arith.constant 6 : index
    %c1_94 = arith.constant 1 : index
    %c0_95 = arith.constant 0 : index
    %177 = vector.load %arg11[%c6, %c1_94, %c0_95] : memref<10x18x24xf32, #tpu.memory_space<vmem>>, vector<1x16x24xf32>
    %178 = vector.shape_cast %177 : vector<1x16x24xf32> to vector<16x24xf32>
    %179 = vector.shape_cast %176 : vector<16x24xf32> to vector<1x16x24xf32>
    tpu.vector_store %arg11[%c6, %c1_94, %c0_95], %179 {strides = array<i32>} : memref<10x18x24xf32, #tpu.memory_space<vmem>>, vector<1x16x24xf32>,
    %c7_i32 = arith.constant 7 : i32
    %180 = arith.addi %4, %c7_i32 : i32
    %c1_i32_96 = arith.constant 1 : i32
    %181 = arith.subi %180, %c1_i32_96 : i32
    %c0_i32_97 = arith.constant 0 : i32
    %182 = arith.cmpi sge, %181, %c0_i32_97 : i32
    %c16_i32_98 = arith.constant 16 : i32
    %183 = arith.cmpi slt, %181, %c16_i32_98 : i32
    %184 = arith.andi %182, %183 : i1
    %185 = arith.extui %184 : i1 to i32
    %186 = arith.sitofp %185 : i32 to f32
    %c0_i32_99 = arith.constant 0 : i32
    %c15_i32_100 = arith.constant 15 : i32
    %187 = arith.maxsi %c0_i32_99, %181 : i32
    %188 = arith.minsi %c15_i32_100, %187 : i32
    %c0_101 = arith.constant 0 : index
    %189 = arith.index_cast %188 : i32 to index
    %c0_102 = arith.constant 0 : index
    %c0_103 = arith.constant 0 : index
    %190 = vector.load %arg2[%c0_101, %189, %c0_102, %c0_103] : memref<1x16x16x4xf32, #tpu.memory_space<vmem>>, vector<1x1x16x4xf32>
    %191 = vector.shape_cast %190 : vector<1x1x16x4xf32> to vector<1x16x4xf32>
    %192 = vector.shape_cast %191 : vector<1x16x4xf32> to vector<16x4xf32>
    %cst_104 = arith.constant dense<0.000000e+00> : vector<16x24xf32>
    %193 = tpu.matmul %192, %2, %cst_104 {dimension_numbers = #tpu.dot_dimension_numbers<[1], [0], [0], [1], [0, 0, 1, 1], [], []>} : vector<16x4xf32>, vector<4x24xf32>, vector<16x24xf32> -> vector<16x24xf32>
    %194 = vector.broadcast %3 : vector<1x24xf32> to vector<16x24xf32>
    %195 = arith.addf %193, %194 : vector<16x24xf32>
    %cst_105 = arith.constant 0.000000e+00 : f32
    %cst_106 = arith.constant 6.000000e+00 : f32
    %196 = vector.broadcast %cst_105 : f32 to vector<16x24xf32>
    %197 = arith.maximumf %196, %195 : vector<16x24xf32>
    %198 = vector.broadcast %cst_106 : f32 to vector<16x24xf32>
    %199 = arith.minimumf %198, %197 : vector<16x24xf32>
    %200 = vector.broadcast %186 : f32 to vector<16x24xf32>
    %201 = arith.mulf %199, %200 : vector<16x24xf32>
    %c7 = arith.constant 7 : index
    %c1_107 = arith.constant 1 : index
    %c0_108 = arith.constant 0 : index
    %202 = vector.load %arg11[%c7, %c1_107, %c0_108] : memref<10x18x24xf32, #tpu.memory_space<vmem>>, vector<1x16x24xf32>
    %203 = vector.shape_cast %202 : vector<1x16x24xf32> to vector<16x24xf32>
    %204 = vector.shape_cast %201 : vector<16x24xf32> to vector<1x16x24xf32>
    tpu.vector_store %arg11[%c7, %c1_107, %c0_108], %204 {strides = array<i32>} : memref<10x18x24xf32, #tpu.memory_space<vmem>>, vector<1x16x24xf32>,
    %c8_i32_109 = arith.constant 8 : i32
    %205 = arith.addi %4, %c8_i32_109 : i32
    %c1_i32_110 = arith.constant 1 : i32
    %206 = arith.subi %205, %c1_i32_110 : i32
    %c0_i32_111 = arith.constant 0 : i32
    %207 = arith.cmpi sge, %206, %c0_i32_111 : i32
    %c16_i32_112 = arith.constant 16 : i32
    %208 = arith.cmpi slt, %206, %c16_i32_112 : i32
    %209 = arith.andi %207, %208 : i1
    %210 = arith.extui %209 : i1 to i32
    %211 = arith.sitofp %210 : i32 to f32
    %c0_i32_113 = arith.constant 0 : i32
    %c15_i32_114 = arith.constant 15 : i32
    %212 = arith.maxsi %c0_i32_113, %206 : i32
    %213 = arith.minsi %c15_i32_114, %212 : i32
    %c0_115 = arith.constant 0 : index
    %214 = arith.index_cast %213 : i32 to index
    %c0_116 = arith.constant 0 : index
    %c0_117 = arith.constant 0 : index
    %215 = vector.load %arg2[%c0_115, %214, %c0_116, %c0_117] : memref<1x16x16x4xf32, #tpu.memory_space<vmem>>, vector<1x1x16x4xf32>
    %216 = vector.shape_cast %215 : vector<1x1x16x4xf32> to vector<1x16x4xf32>
    %217 = vector.shape_cast %216 : vector<1x16x4xf32> to vector<16x4xf32>
    %cst_118 = arith.constant dense<0.000000e+00> : vector<16x24xf32>
    %218 = tpu.matmul %217, %2, %cst_118 {dimension_numbers = #tpu.dot_dimension_numbers<[1], [0], [0], [1], [0, 0, 1, 1], [], []>} : vector<16x4xf32>, vector<4x24xf32>, vector<16x24xf32> -> vector<16x24xf32>
    %219 = vector.broadcast %3 : vector<1x24xf32> to vector<16x24xf32>
    %220 = arith.addf %218, %219 : vector<16x24xf32>
    %cst_119 = arith.constant 0.000000e+00 : f32
    %cst_120 = arith.constant 6.000000e+00 : f32
    %221 = vector.broadcast %cst_119 : f32 to vector<16x24xf32>
    %222 = arith.maximumf %221, %220 : vector<16x24xf32>
    %223 = vector.broadcast %cst_120 : f32 to vector<16x24xf32>
    %224 = arith.minimumf %223, %222 : vector<16x24xf32>
    %225 = vector.broadcast %211 : f32 to vector<16x24xf32>
    %226 = arith.mulf %224, %225 : vector<16x24xf32>
    %c8 = arith.constant 8 : index
    %c1_121 = arith.constant 1 : index
    %c0_122 = arith.constant 0 : index
    %227 = vector.load %arg11[%c8, %c1_121, %c0_122] : memref<10x18x24xf32, #tpu.memory_space<vmem>>, vector<1x16x24xf32>
    %228 = vector.shape_cast %227 : vector<1x16x24xf32> to vector<16x24xf32>
    %229 = vector.shape_cast %226 : vector<16x24xf32> to vector<1x16x24xf32>
    tpu.vector_store %arg11[%c8, %c1_121, %c0_122], %229 {strides = array<i32>} : memref<10x18x24xf32, #tpu.memory_space<vmem>>, vector<1x16x24xf32>,
    %c9_i32 = arith.constant 9 : i32
    %230 = arith.addi %4, %c9_i32 : i32
    %c1_i32_123 = arith.constant 1 : i32
    %231 = arith.subi %230, %c1_i32_123 : i32
    %c0_i32_124 = arith.constant 0 : i32
    %232 = arith.cmpi sge, %231, %c0_i32_124 : i32
    %c16_i32_125 = arith.constant 16 : i32
    %233 = arith.cmpi slt, %231, %c16_i32_125 : i32
    %234 = arith.andi %232, %233 : i1
    %235 = arith.extui %234 : i1 to i32
    %236 = arith.sitofp %235 : i32 to f32
    %c0_i32_126 = arith.constant 0 : i32
    %c15_i32_127 = arith.constant 15 : i32
    %237 = arith.maxsi %c0_i32_126, %231 : i32
    %238 = arith.minsi %c15_i32_127, %237 : i32
    %c0_128 = arith.constant 0 : index
    %239 = arith.index_cast %238 : i32 to index
    %c0_129 = arith.constant 0 : index
    %c0_130 = arith.constant 0 : index
    %240 = vector.load %arg2[%c0_128, %239, %c0_129, %c0_130] : memref<1x16x16x4xf32, #tpu.memory_space<vmem>>, vector<1x1x16x4xf32>
    %241 = vector.shape_cast %240 : vector<1x1x16x4xf32> to vector<1x16x4xf32>
    %242 = vector.shape_cast %241 : vector<1x16x4xf32> to vector<16x4xf32>
    %cst_131 = arith.constant dense<0.000000e+00> : vector<16x24xf32>
    %243 = tpu.matmul %242, %2, %cst_131 {dimension_numbers = #tpu.dot_dimension_numbers<[1], [0], [0], [1], [0, 0, 1, 1], [], []>} : vector<16x4xf32>, vector<4x24xf32>, vector<16x24xf32> -> vector<16x24xf32>
    %244 = vector.broadcast %3 : vector<1x24xf32> to vector<16x24xf32>
    %245 = arith.addf %243, %244 : vector<16x24xf32>
    %cst_132 = arith.constant 0.000000e+00 : f32
    %cst_133 = arith.constant 6.000000e+00 : f32
    %246 = vector.broadcast %cst_132 : f32 to vector<16x24xf32>
    %247 = arith.maximumf %246, %245 : vector<16x24xf32>
    %248 = vector.broadcast %cst_133 : f32 to vector<16x24xf32>
    %249 = arith.minimumf %248, %247 : vector<16x24xf32>
    %250 = vector.broadcast %236 : f32 to vector<16x24xf32>
    %251 = arith.mulf %249, %250 : vector<16x24xf32>
    %c9 = arith.constant 9 : index
    %c1_134 = arith.constant 1 : index
    %c0_135 = arith.constant 0 : index
    %252 = vector.load %arg11[%c9, %c1_134, %c0_135] : memref<10x18x24xf32, #tpu.memory_space<vmem>>, vector<1x16x24xf32>
    %253 = vector.shape_cast %252 : vector<1x16x24xf32> to vector<16x24xf32>
    %254 = vector.shape_cast %251 : vector<16x24xf32> to vector<1x16x24xf32>
    tpu.vector_store %arg11[%c9, %c1_134, %c0_135], %254 {strides = array<i32>} : memref<10x18x24xf32, #tpu.memory_space<vmem>>, vector<1x16x24xf32>,
    %c0_136 = arith.constant 0 : index
    %c0_137 = arith.constant 0 : index
    %c0_138 = arith.constant 0 : index
    %255 = vector.load %arg5[%c0_136, %c0_137, %c0_138] : memref<3x3x24xf32, #tpu.memory_space<vmem>>, vector<3x3x24xf32>
    %c0_139 = arith.constant 0 : index
    %c0_140 = arith.constant 0 : index
    %256 = vector.load %arg6[%c0_139, %c0_140] : memref<1x24xf32, #tpu.memory_space<vmem>>, vector<1x24xf32>
    %257 = vector.shape_cast %256 : vector<1x24xf32> to vector<1x1x24xf32>
    %cst_141 = arith.constant 0.000000e+00 : f32
    %258 = vector.broadcast %cst_141 : f32 to vector<8x16x24xf32>
    %c0_142 = arith.constant 0 : index
    %c0_143 = arith.constant 0 : index
    %c0_144 = arith.constant 0 : index
    %259 = vector.load %arg11[%c0_142, %c0_143, %c0_144] : memref<10x18x24xf32, #tpu.memory_space<vmem>>, vector<8x16x24xf32>
    %260 = vector.extract_strided_slice %255 {offsets = [0, 0, 0], sizes = [1, 1, 24], strides = [1, 1, 1]} : vector<3x3x24xf32> to vector<1x1x24xf32>
    %261 = vector.shape_cast %260 : vector<1x1x24xf32> to vector<24xf32>
    %262 = vector.shape_cast %261 : vector<24xf32> to vector<1x1x24xf32>
    %263 = vector.broadcast %262 : vector<1x1x24xf32> to vector<8x16x24xf32>
    %264 = arith.mulf %259, %263 : vector<8x16x24xf32>
    %265 = arith.addf %258, %264 : vector<8x16x24xf32>
    %c0_145 = arith.constant 0 : index
    %c1_146 = arith.constant 1 : index
    %c0_147 = arith.constant 0 : index
    %266 = vector.load %arg11[%c0_145, %c1_146, %c0_147] : memref<10x18x24xf32, #tpu.memory_space<vmem>>, vector<8x16x24xf32>
    %267 = vector.extract_strided_slice %255 {offsets = [0, 1, 0], sizes = [1, 1, 24], strides = [1, 1, 1]} : vector<3x3x24xf32> to vector<1x1x24xf32>
    %268 = vector.shape_cast %267 : vector<1x1x24xf32> to vector<24xf32>
    %269 = vector.shape_cast %268 : vector<24xf32> to vector<1x1x24xf32>
    %270 = vector.broadcast %269 : vector<1x1x24xf32> to vector<8x16x24xf32>
    %271 = arith.mulf %266, %270 : vector<8x16x24xf32>
    %272 = arith.addf %265, %271 : vector<8x16x24xf32>
    %c0_148 = arith.constant 0 : index
    %c2_149 = arith.constant 2 : index
    %c0_150 = arith.constant 0 : index
    %273 = vector.load %arg11[%c0_148, %c2_149, %c0_150] : memref<10x18x24xf32, #tpu.memory_space<vmem>>, vector<8x16x24xf32>
    %274 = vector.extract_strided_slice %255 {offsets = [0, 2, 0], sizes = [1, 1, 24], strides = [1, 1, 1]} : vector<3x3x24xf32> to vector<1x1x24xf32>
    %275 = vector.shape_cast %274 : vector<1x1x24xf32> to vector<24xf32>
    %276 = vector.shape_cast %275 : vector<24xf32> to vector<1x1x24xf32>
    %277 = vector.broadcast %276 : vector<1x1x24xf32> to vector<8x16x24xf32>
    %278 = arith.mulf %273, %277 : vector<8x16x24xf32>
    %279 = arith.addf %272, %278 : vector<8x16x24xf32>
    %c1_151 = arith.constant 1 : index
    %c0_152 = arith.constant 0 : index
    %c0_153 = arith.constant 0 : index
    %280 = vector.load %arg11[%c1_151, %c0_152, %c0_153] : memref<10x18x24xf32, #tpu.memory_space<vmem>>, vector<8x16x24xf32>
    %281 = vector.extract_strided_slice %255 {offsets = [1, 0, 0], sizes = [1, 1, 24], strides = [1, 1, 1]} : vector<3x3x24xf32> to vector<1x1x24xf32>
    %282 = vector.shape_cast %281 : vector<1x1x24xf32> to vector<24xf32>
    %283 = vector.shape_cast %282 : vector<24xf32> to vector<1x1x24xf32>
    %284 = vector.broadcast %283 : vector<1x1x24xf32> to vector<8x16x24xf32>
    %285 = arith.mulf %280, %284 : vector<8x16x24xf32>
    %286 = arith.addf %279, %285 : vector<8x16x24xf32>
    %c1_154 = arith.constant 1 : index
    %c1_155 = arith.constant 1 : index
    %c0_156 = arith.constant 0 : index
    %287 = vector.load %arg11[%c1_154, %c1_155, %c0_156] : memref<10x18x24xf32, #tpu.memory_space<vmem>>, vector<8x16x24xf32>
    %288 = vector.extract_strided_slice %255 {offsets = [1, 1, 0], sizes = [1, 1, 24], strides = [1, 1, 1]} : vector<3x3x24xf32> to vector<1x1x24xf32>
    %289 = vector.shape_cast %288 : vector<1x1x24xf32> to vector<24xf32>
    %290 = vector.shape_cast %289 : vector<24xf32> to vector<1x1x24xf32>
    %291 = vector.broadcast %290 : vector<1x1x24xf32> to vector<8x16x24xf32>
    %292 = arith.mulf %287, %291 : vector<8x16x24xf32>
    %293 = arith.addf %286, %292 : vector<8x16x24xf32>
    %c1_157 = arith.constant 1 : index
    %c2_158 = arith.constant 2 : index
    %c0_159 = arith.constant 0 : index
    %294 = vector.load %arg11[%c1_157, %c2_158, %c0_159] : memref<10x18x24xf32, #tpu.memory_space<vmem>>, vector<8x16x24xf32>
    %295 = vector.extract_strided_slice %255 {offsets = [1, 2, 0], sizes = [1, 1, 24], strides = [1, 1, 1]} : vector<3x3x24xf32> to vector<1x1x24xf32>
    %296 = vector.shape_cast %295 : vector<1x1x24xf32> to vector<24xf32>
    %297 = vector.shape_cast %296 : vector<24xf32> to vector<1x1x24xf32>
    %298 = vector.broadcast %297 : vector<1x1x24xf32> to vector<8x16x24xf32>
    %299 = arith.mulf %294, %298 : vector<8x16x24xf32>
    %300 = arith.addf %293, %299 : vector<8x16x24xf32>
    %c2_160 = arith.constant 2 : index
    %c0_161 = arith.constant 0 : index
    %c0_162 = arith.constant 0 : index
    %301 = vector.load %arg11[%c2_160, %c0_161, %c0_162] : memref<10x18x24xf32, #tpu.memory_space<vmem>>, vector<8x16x24xf32>
    %302 = vector.extract_strided_slice %255 {offsets = [2, 0, 0], sizes = [1, 1, 24], strides = [1, 1, 1]} : vector<3x3x24xf32> to vector<1x1x24xf32>
    %303 = vector.shape_cast %302 : vector<1x1x24xf32> to vector<24xf32>
    %304 = vector.shape_cast %303 : vector<24xf32> to vector<1x1x24xf32>
    %305 = vector.broadcast %304 : vector<1x1x24xf32> to vector<8x16x24xf32>
    %306 = arith.mulf %301, %305 : vector<8x16x24xf32>
    %307 = arith.addf %300, %306 : vector<8x16x24xf32>
    %c2_163 = arith.constant 2 : index
    %c1_164 = arith.constant 1 : index
    %c0_165 = arith.constant 0 : index
    %308 = vector.load %arg11[%c2_163, %c1_164, %c0_165] : memref<10x18x24xf32, #tpu.memory_space<vmem>>, vector<8x16x24xf32>
    %309 = vector.extract_strided_slice %255 {offsets = [2, 1, 0], sizes = [1, 1, 24], strides = [1, 1, 1]} : vector<3x3x24xf32> to vector<1x1x24xf32>
    %310 = vector.shape_cast %309 : vector<1x1x24xf32> to vector<24xf32>
    %311 = vector.shape_cast %310 : vector<24xf32> to vector<1x1x24xf32>
    %312 = vector.broadcast %311 : vector<1x1x24xf32> to vector<8x16x24xf32>
    %313 = arith.mulf %308, %312 : vector<8x16x24xf32>
    %314 = arith.addf %307, %313 : vector<8x16x24xf32>
    %c2_166 = arith.constant 2 : index
    %c2_167 = arith.constant 2 : index
    %c0_168 = arith.constant 0 : index
    %315 = vector.load %arg11[%c2_166, %c2_167, %c0_168] : memref<10x18x24xf32, #tpu.memory_space<vmem>>, vector<8x16x24xf32>
    %316 = vector.extract_strided_slice %255 {offsets = [2, 2, 0], sizes = [1, 1, 24], strides = [1, 1, 1]} : vector<3x3x24xf32> to vector<1x1x24xf32>
    %317 = vector.shape_cast %316 : vector<1x1x24xf32> to vector<24xf32>
    %318 = vector.shape_cast %317 : vector<24xf32> to vector<1x1x24xf32>
    %319 = vector.broadcast %318 : vector<1x1x24xf32> to vector<8x16x24xf32>
    %320 = arith.mulf %315, %319 : vector<8x16x24xf32>
    %321 = arith.addf %314, %320 : vector<8x16x24xf32>
    %322 = vector.broadcast %257 : vector<1x1x24xf32> to vector<8x16x24xf32>
    %323 = arith.addf %321, %322 : vector<8x16x24xf32>
    %cst_169 = arith.constant 0.000000e+00 : f32
    %cst_170 = arith.constant 6.000000e+00 : f32
    %324 = vector.broadcast %cst_169 : f32 to vector<8x16x24xf32>
    %325 = arith.maximumf %324, %323 : vector<8x16x24xf32>
    %326 = vector.broadcast %cst_170 : f32 to vector<8x16x24xf32>
    %327 = arith.minimumf %326, %325 : vector<8x16x24xf32>
    %328 = vector.shape_cast %327 : vector<8x16x24xf32> to vector<128x24xf32>
    %c0_171 = arith.constant 0 : index
    %c0_172 = arith.constant 0 : index
    %329 = vector.load %arg7[%c0_171, %c0_172] : memref<4x24xf32, #tpu.memory_space<vmem>>, vector<4x24xf32>
    %cst_173 = arith.constant dense<0.000000e+00> : vector<4x128xf32>
    %330 = tpu.matmul %329, %328, %cst_173 {dimension_numbers = #tpu.dot_dimension_numbers<[1], [1], [0], [0], [0, 0, 1, 0], [], []>} : vector<4x24xf32>, vector<128x24xf32>, vector<4x128xf32> -> vector<4x128xf32>
    %c0_174 = arith.constant 0 : index
    %c0_175 = arith.constant 0 : index
    %331 = vector.load %arg8[%c0_174, %c0_175] : memref<4x1xf32, #tpu.memory_space<vmem>>, vector<4x1xf32>
    %332 = vector.broadcast %331 : vector<4x1xf32> to vector<4x128xf32>
    %333 = arith.addf %330, %332 : vector<4x128xf32>
    %c0_176 = arith.constant 0 : index
    %c0_177 = arith.constant 0 : index
    %c0_178 = arith.constant 0 : index
    %334 = vector.load %arg9[%c0_176, %c0_177, %c0_178] : memref<1x4x128xf32, #tpu.memory_space<vmem>>, vector<1x4x128xf32>
    %335 = vector.shape_cast %334 : vector<1x4x128xf32> to vector<4x128xf32>
    %336 = arith.addf %333, %335 : vector<4x128xf32>
    %c0_179 = arith.constant 0 : index
    %c0_180 = arith.constant 0 : index
    %c0_181 = arith.constant 0 : index
    %337 = vector.load %arg10[%c0_179, %c0_180, %c0_181] : memref<1x4x128xf32, #tpu.memory_space<vmem>>, vector<1x4x128xf32>
    %338 = vector.shape_cast %337 : vector<1x4x128xf32> to vector<4x128xf32>
    %339 = vector.shape_cast %336 : vector<4x128xf32> to vector<1x4x128xf32>
    tpu.vector_store %arg10[%c0_179, %c0_180, %c0_181], %339 {strides = array<i32>} : memref<1x4x128xf32, #tpu.memory_space<vmem>>, vector<1x4x128xf32>,
    return
  }
  func.func @transform_0(%arg0: i32, %arg1: i32) -> (i32, i32, i32, i32) {
    %c0_i32 = arith.constant 0 : i32
    %c0_i32_0 = arith.constant 0 : i32
    %c0_i32_1 = arith.constant 0 : i32
    %c0_i32_2 = arith.constant 0 : i32
    return %arg0, %c0_i32, %c0_i32_0, %c0_i32_1 : i32, i32, i32, i32
  }
  func.func @transform_1(%arg0: i32, %arg1: i32) -> (i32, i32) {
    %c0_i32 = arith.constant 0 : i32
    %c0_i32_0 = arith.constant 0 : i32
    %c0_i32_1 = arith.constant 0 : i32
    return %c0_i32, %c0_i32_0 : i32, i32
  }
  func.func @transform_2(%arg0: i32, %arg1: i32) -> (i32, i32) {
    %c0_i32 = arith.constant 0 : i32
    %c0_i32_0 = arith.constant 0 : i32
    %c0_i32_1 = arith.constant 0 : i32
    return %c0_i32, %c0_i32_0 : i32, i32
  }
  func.func @transform_3(%arg0: i32, %arg1: i32) -> (i32, i32, i32) {
    %c0_i32 = arith.constant 0 : i32
    %c0_i32_0 = arith.constant 0 : i32
    %c0_i32_1 = arith.constant 0 : i32
    %c0_i32_2 = arith.constant 0 : i32
    return %c0_i32, %c0_i32_0, %c0_i32_1 : i32, i32, i32
  }
  func.func @transform_4(%arg0: i32, %arg1: i32) -> (i32, i32) {
    %c0_i32 = arith.constant 0 : i32
    %c0_i32_0 = arith.constant 0 : i32
    %c0_i32_1 = arith.constant 0 : i32
    return %c0_i32, %c0_i32_0 : i32, i32
  }
  func.func @transform_5(%arg0: i32, %arg1: i32) -> (i32, i32) {
    %c0_i32 = arith.constant 0 : i32
    %c0_i32_0 = arith.constant 0 : i32
    %c0_i32_1 = arith.constant 0 : i32
    return %c0_i32, %c0_i32_0 : i32, i32
  }
  func.func @transform_6(%arg0: i32, %arg1: i32) -> (i32, i32) {
    %c0_i32 = arith.constant 0 : i32
    %c0_i32_0 = arith.constant 0 : i32
    %c0_i32_1 = arith.constant 0 : i32
    return %c0_i32, %c0_i32_0 : i32, i32
  }
  func.func @transform_7(%arg0: i32, %arg1: i32) -> (i32, i32, i32) {
    %c0_i32 = arith.constant 0 : i32
    %c0_i32_0 = arith.constant 0 : i32
    return %arg0, %c0_i32, %arg1 : i32, i32, i32
  }
  func.func @transform_8(%arg0: i32, %arg1: i32) -> (i32, i32, i32) {
    %c0_i32 = arith.constant 0 : i32
    %c0_i32_0 = arith.constant 0 : i32
    return %arg0, %c0_i32, %arg1 : i32, i32, i32
  }
}

</mosaic_0001>

<bundles_post_ra>
// kernel: mbconv_forward.1
= control target key start
LH: loop header
LB: loop body
LE: loop exit
PB: predicated region body
PF: predicated region fallthrough
CT: control target
= control target key end

     0   :  { %s4630_s0 = inlined_call_operand.hbm [shape: f32[2,16,16,4], index: 0, kind: input, shape index: {}]   ;;  %s4631_s1 = inlined_call_operand.hbm [shape: f32[4,24], index: 1, kind: input, shape index: {}]   ;;  %s4632_s2 = inlined_call_operand.hbm [shape: f32[1,24], index: 2, kind: input, shape index: {}]   ;;  %s4633_s3 = inlined_call_operand.hbm [shape: f32[3,3,24], index: 3, kind: input, shape index: {}]   ;;  %s4634_s4 = inlined_call_operand.hbm [shape: f32[1,24], index: 4, kind: input, shape index: {}]   ;;  %s4635_s5 = inlined_call_operand.hbm [shape: f32[4,24], index: 5, kind: input, shape index: {}]   ;;  %s4636_s6 = inlined_call_operand.hbm [shape: f32[4,1], index: 6, kind: input, shape index: {}]   ;;  %s4637_s7 = inlined_call_operand.hbm [shape: f32[2,4,256], index: 7, kind: input, shape index: {}]   ;;  %s4638_s8 = inlined_call_operand.hbm [shape: f32[2,4,256], index: 8, kind: output, shape index: {}]  }
   0x1   :  { %4656 = sst [smem:[#allocation30_spill]] %s4630_s0 }
   0x2   :  { %4657 = sst [smem:[#allocation31_spill]] %s4631_s1 }
   0x3   :  { %4658 = sst [smem:[#allocation32_spill]] %s4632_s2 }
   0x4   :  { %4659 = sst [smem:[#allocation33_spill]] %s4633_s3 }
   0x5   :  { %4660 = sst [smem:[#allocation34_spill]] %s4634_s4 }
   0x6   :  { %4661 = sst [smem:[#allocation35_spill]] %s4635_s5 }
   0x7   :  { %4662 = sst [smem:[#allocation36_spill]] %s4636_s6 }
   0x8   :  { %4663 = sst [smem:[#allocation37_spill]] %s4637_s7 }
   0x9   :  { %4664 = sst [smem:[#allocation38_spill]] %s4638_s8 }
   0xa   :  { %13 = vsyncpa [#allocation4], 0 }
   0xb   :  { %15 = vsyncpa [#allocation4 + $0x1], 0 }
   0xc   :  { %16 = vsyncpa [#allocation7], 0 }
   0xd   :  { %17 = vsyncpa [#allocation10], 0 }
   0xe   :  { %18 = vsyncpa [#allocation13], 0 }
   0xf   :  { %19 = vsyncpa [#allocation16], 0 }
  0x10   :  { %21 = vsyncpa [#allocation16 + $0x1], 0 }
  0x11   :  { %22 = vsyncpa [#allocation5], 0 }
  0x12   :  { %24 = vsyncpa [#allocation5 + $0x1], 0  ;;  %s3361_s27 = smov 0   ;;  %s3363_s28 = smov 0  }
  0x13   :  { %s3365_s29 = smov 0   ;;  %s3367_s30 = smov 0  }
  0x14   :  { %s3369_s9 = smov 0   ;;  %s3371_s10 = smov 0  }
  0x15   :  { %s3373_s11 = smov 0   ;;  %s3375_s12 = smov 0  }
  0x16   :  { %s3377_s13 = smov 0   ;;  %s3379_s14 = smov 0  }
  0x17   :  { %s3381_s15 = smov 0  }
  0x18 LB: > { %4665 = sst [smem:[#allocation24_spill]] %s3281_s11  ;;  %s4639_s16 = sadd.s32 4294967295, %s3297_s15   ;;  %s3297_s15 = sphi %s3381_s15, %s30_s15   ;;  %s3293_s14 = sphi %s3379_s14, %s4728_s14   ;;  %s3289_s13 = sphi %s3377_s13, %s4727_s13   ;;  %s3285_s12 = sphi %s3375_s12, %s4726_s12   ;;  %s3281_s11 = sphi %s3373_s11, %s4725_s11   ;;  %s3277_s10 = sphi %s3371_s10, %s4724_s10   ;;  %s3273_s9 = sphi %s3369_s9, %s4723_s9   ;;  %s3269_s30 = sphi %s3367_s30, %s4722_s30   ;;  %s3265_s29 = sphi %s3365_s29, %s4721_s29   ;;  %s3261_s28 = sphi %s3363_s28, %s4720_s28   ;;  %s3257_s27 = sphi %s3361_s27, %s4719_s27  }
  0x19   : > { %4666 = sst [smem:[#allocation25_spill]] %s3285_s12  ;;  %p2420_p0 = scmp.ge.s32.totalorder %s3297_s15, 1 }
  0x1a   : > { %p3420_p1 = scmp.eq.s32.totalorder %s4639_s16, 0  ;;  %p255_p2 = scmp.lt.s32.totalorder %s3297_s15, 5 }
  0x1b   : > { %s3299_s19 = smov [#allocation6]   ;;  %s3300_s21 = smov [#allocation9]  }
  0x1c   : > { %s4667_s17 = scalar_select %p3420_p1, 1, 0 }
  0x1d   : > { %p3425_p3 = pnand %p2420_p0, %p255_p2  ;;  %s268_s20 = sshll.u32 %s3299_s19, 4  ;;  %s269_s20 = int_to_ptr.vmem [resolvable:$true] %s268_s20 }
  0x1e   : > { %s289_s22 = sshll.u32 %s3300_s21, 4  ;;  %s3301_s24 = smov [#allocation12]   ;;  %s3437_s22 = int_to_ptr.vmem [resolvable:$true] %s289_s22 }
  0x1f   : > { %s4668_s18 = scalar_select %p3425_p3, 1, 0 }
  0x20   : > { %p2784_p4 = pneg %p3425_p3  ;;  %s3439_s25 = sshll.u32 %s3301_s24, 4  ;;  %s315_s25 = int_to_ptr.vmem [resolvable:$true] %s3439_s25 }
  0x21   : > { %4669 = sst [smem:[#allocation26_spill]] %s4668_s18  ;;  %s4671_s1 = sld [smem:[#allocation31_spill]] }
  0x22   : > { %p3433_p5 = pnand %p2784_p4, %p3420_p1 }
  0x24   : > { %p3449_p7 = pneg %p3433_p5 }
  0x27   : > { %s2931_s19 = scalar_lea.hbm %s4671_s1, 64 }
  0x28   : > { %p2932_p6 = scmp.ne.s32.totalorder %s4671_s1, %s2931_s19  ;;  %p2938_p10 = scmp.lt.u32.totalorder %s2931_s19, %s4671_s1 }
  0x2a   : > { %p2934_p8 = pnand %p3449_p7, %p2932_p6 }
  0x2c   : > { %p2935_p9 = pneg %p2934_p8 }
  0x2e   : > { %p2940_p11 = pnand %p2938_p10, %p2935_p9 }
  0x30   : > { %2943 = shalt.err (!%p2940_p11)
}
  0x31   : > { %s2944_s16 = scalar_lea.vmem %s269_s20, 64  ;;  %p2952_p2 = scmp.lt.s32.totalorder %s269_s20, %s269_s20 }
  0x32   : > { %p2945_p12 = scmp.ne.s32.totalorder %s269_s20, %s2944_s16  ;;  %p2953_p4 = scmp.lt.s32.totalorder %s2944_s16, %s2944_s16 }
  0x34   : > { %p2947_p13 = pnand %p2945_p12, %p3449_p7  ;;  %p2954_p3 = por %p2953_p4, %p2952_p2 }
  0x36   : > { %p2948_p0 = pneg %p2947_p13 }
  0x38   : > { %p2955_p1 = pnand %p2954_p3, %p2948_p0 }
  0x3a   : > { %2958 = shalt.err (!%p2955_p1)
}
  0x3b   : > { %2787 = dma.hbm_to_vmem [thread:$0]  (!%p3433_p5), %s4671_s1, 64, %s269_s20, [#allocation7]  }
  0x3c   : > { %s4673_s3 = sld [smem:[#allocation33_spill]] }
  0x42   : > { %s2959_s19 = scalar_lea.hbm %s4673_s3, 192 }
  0x43   : > { %p2960_p6 = scmp.ne.s32.totalorder %s4673_s3, %s2959_s19  ;;  %p2966_p1 = scmp.lt.u32.totalorder %s2959_s19, %s4673_s3 }
  0x45   : > { %p2962_p8 = pnand %p2960_p6, %p3449_p7 }
  0x47   : > { %p2963_p9 = pneg %p2962_p8 }
  0x49   : > { %p2968_p3 = pnand %p2966_p1, %p2963_p9 }
  0x4b   : > { %2971 = shalt.err (!%p2968_p3)
}
  0x4c   : > { %s2972_s20 = scalar_lea.vmem %s3437_s22, 192  ;;  %p2980_p13 = scmp.lt.s32.totalorder %s3437_s22, %s3437_s22 }
  0x4d   : > { %p2973_p10 = scmp.ne.s32.totalorder %s3437_s22, %s2972_s20  ;;  %p2981_p0 = scmp.lt.s32.totalorder %s2972_s20, %s2972_s20 }
  0x4f   : > { %p2975_p11 = pnand %p2973_p10, %p3449_p7  ;;  %p2982_p2 = por %p2981_p0, %p2980_p13 }
  0x51   : > { %p2976_p12 = pneg %p2975_p11 }
  0x53   : > { %p2983_p4 = pnand %p2982_p2, %p2976_p12 }
  0x55   : > { %2986 = shalt.err (!%p2983_p4)
}
  0x56   : > { %s3302_s18 = smov 64   ;;  %s3303_s7 = smov 4  }
  0x57   : > { %2793 = dma.hbm_to_vmem [thread:$0]  (!%p3433_p5), %s4673_s3, 192, %s3437_s22, [#allocation10], %s3302_s18, %s3302_s18, %s3303_s7  }
  0x58   : > { %s4674_s5 = sld [smem:[#allocation35_spill]] }
  0x5e   : > { %s2987_s19 = scalar_lea.hbm %s4674_s5, 64 }
  0x5f   : > { %p2988_p6 = scmp.ne.s32.totalorder %s4674_s5, %s2987_s19  ;;  %p2994_p1 = scmp.lt.u32.totalorder %s2987_s19, %s4674_s5 }
  0x61   : > { %p2990_p8 = pnand %p2988_p6, %p3449_p7 }
  0x63   : > { %p2991_p9 = pneg %p2990_p8 }
  0x65   : > { %p2996_p3 = pnand %p2994_p1, %p2991_p9 }
  0x67   : > { %2999 = shalt.err (!%p2996_p3)
}
  0x68   : > { %s3000_s8 = scalar_lea.vmem %s315_s25, 64  ;;  %p3008_p13 = scmp.lt.s32.totalorder %s315_s25, %s315_s25 }
  0x69   : > { %p3001_p10 = scmp.ne.s32.totalorder %s315_s25, %s3000_s8  ;;  %p3009_p0 = scmp.lt.s32.totalorder %s3000_s8, %s3000_s8 }
  0x6b   : > { %p3003_p11 = pnand %p3001_p10, %p3449_p7  ;;  %p3010_p2 = por %p3009_p0, %p3008_p13 }
  0x6d   : > { %p3004_p12 = pneg %p3003_p11 }
  0x6f   : > { %p3011_p4 = pnand %p3010_p2, %p3004_p12 }
  0x71   : > { %3014 = shalt.err (!%p3011_p4)
}
  0x72   : > { %2799 = dma.hbm_to_vmem [thread:$0]  (!%p3433_p5), %s4674_s5, 64, %s315_s25, [#allocation13]  }
  0x73   : > { %s3304_s1 = smov [#allocation8]   ;;  %s3305_s12 = smov [#allocation11]  }
  0x74   : > { %s279_s7 = sshll.u32 %s3304_s1, 4  ;;  %s303_s11 = sshll.u32 %s3305_s12, 4  ;;  %s280_s7 = int_to_ptr.vmem [resolvable:$true] %s279_s7  ;;  %s304_s11 = int_to_ptr.vmem [resolvable:$true] %s303_s11 }
  0x75   : > { %s4675_s2 = sld [smem:[#allocation32_spill]] }
  0x7b   : > { %s3015_s24 = scalar_lea.hbm %s4675_s2, 16 }
  0x7c   : > { %p3016_p6 = scmp.ne.s32.totalorder %s4675_s2, %s3015_s24  ;;  %p3022_p1 = scmp.lt.u32.totalorder %s3015_s24, %s4675_s2 }
  0x7e   : > { %p3018_p8 = pnand %p3016_p6, %p3449_p7 }
  0x80   : > { %p3019_p9 = pneg %p3018_p8 }
  0x82   : > { %p3024_p3 = pnand %p3022_p1, %p3019_p9 }
  0x84   : > { %3027 = shalt.err (!%p3024_p3)
}
  0x85   : > { %s3028_s25 = scalar_lea.vmem %s280_s7, 16  ;;  %s3035_s18 = scalar_lea.vmem %s280_s7, 32 }
  0x86   : > { %p3029_p10 = scmp.ne.s32.totalorder %s280_s7, %s3028_s25  ;;  %p3036_p13 = scmp.lt.s32.totalorder %s280_s7, %s280_s7 }
  0x87   : > { %p3037_p0 = scmp.lt.s32.totalorder %s3035_s18, %s3028_s25 }
  0x88   : > { %p3031_p11 = pnand %p3029_p10, %p3449_p7 }
  0x89   : > { %p3038_p2 = por %p3037_p0, %p3036_p13 }
  0x8a   : > { %p3032_p12 = pneg %p3031_p11 }
  0x8c   : > { %p3039_p4 = pnand %p3038_p2, %p3032_p12 }
  0x8e   : > { %3042 = shalt.err (!%p3039_p4)
}
  0x8f   : > { %2790 = dma.hbm_to_vmem [thread:$0]  (!%p3433_p5), %s4675_s2, 16, %s280_s7, [#allocation7]  }
  0x90   : > { %s4676_s4 = sld [smem:[#allocation34_spill]] }
  0x96   : > { %s3043_s24 = scalar_lea.hbm %s4676_s4, 16 }
  0x97   : > { %p3044_p6 = scmp.ne.s32.totalorder %s4676_s4, %s3043_s24  ;;  %p3050_p1 = scmp.lt.u32.totalorder %s3043_s24, %s4676_s4 }
  0x99   : > { %p3046_p8 = pnand %p3044_p6, %p3449_p7 }
  0x9b   : > { %p3047_p9 = pneg %p3046_p8 }
  0x9d   : > { %p3052_p3 = pnand %p3050_p1, %p3047_p9 }
  0x9f   : > { %3055 = shalt.err (!%p3052_p3)
}
  0xa0   : > { %s3056_s25 = scalar_lea.vmem %s304_s11, 16  ;;  %s3063_s7 = scalar_lea.vmem %s304_s11, 32 }
  0xa1   : > { %p3057_p10 = scmp.ne.s32.totalorder %s304_s11, %s3056_s25  ;;  %p3064_p13 = scmp.lt.s32.totalorder %s304_s11, %s304_s11 }
  0xa2   : > { %p3065_p0 = scmp.lt.s32.totalorder %s3063_s7, %s3056_s25 }
  0xa3   : > { %p3059_p11 = pnand %p3057_p10, %p3449_p7 }
  0xa4   : > { %p3066_p2 = por %p3065_p0, %p3064_p13 }
  0xa5   : > { %p3060_p12 = pneg %p3059_p11 }
  0xa7   : > { %p3067_p4 = pnand %p3066_p2, %p3060_p12 }
  0xa9   : > { %3070 = shalt.err (!%p3067_p4)
}
  0xaa   : > { %2796 = dma.hbm_to_vmem [thread:$0]  (!%p3433_p5), %s4676_s4, 16, %s304_s11, [#allocation10]  }
  0xab   : > { %s3306_s12 = smov [#allocation14]   ;;  %s4677_s6 = sld [smem:[#allocation36_spill]] }
  0xac   : > { %s325_s26 = sshll.u32 %s3306_s12, 4  ;;  %s326_s26 = int_to_ptr.vmem [resolvable:$true] %s325_s26 }
  0xb1   : > { %s3071_s16 = scalar_lea.hbm %s4677_s6, 64 }
  0xb2   : > { %p3072_p6 = scmp.ne.s32.totalorder %s4677_s6, %s3071_s16  ;;  %p3078_p1 = scmp.lt.u32.totalorder %s3071_s16, %s4677_s6 }
  0xb4   : > { %p3074_p8 = pnand %p3072_p6, %p3449_p7 }
  0xb6   : > { %p3075_p9 = pneg %p3074_p8 }
  0xb8   : > { %p3080_p3 = pnand %p3078_p1, %p3075_p9 }
  0xba   : > { %3083 = shalt.err (!%p3080_p3)
}
  0xbb   : > { %s3084_s11 = scalar_lea.vmem %s326_s26, 64  ;;  %p3092_p13 = scmp.lt.s32.totalorder %s326_s26, %s326_s26 }
  0xbc   : > { %p3085_p10 = scmp.ne.s32.totalorder %s326_s26, %s3084_s11  ;;  %p3093_p0 = scmp.lt.s32.totalorder %s3084_s11, %s3084_s11 }
  0xbe   : > { %p3087_p11 = pnand %p3085_p10, %p3449_p7  ;;  %p3094_p2 = por %p3093_p0, %p3092_p13 }
  0xc0   : > { %p3088_p12 = pneg %p3087_p11 }
  0xc2   : > { %p3095_p4 = pnand %p3094_p2, %p3088_p12 }
  0xc4   : > { %3098 = shalt.err (!%p3095_p4)
}
  0xc5   : > { %2802 = dma.hbm_to_vmem [thread:$0]  (!%p3433_p5), %s4677_s6, 64, %s326_s26, [#allocation13]  }
  0xc6   : > { %p56_p7 = scmp.ne.s32.totalorder %s3277_s10, %s3273_s9  ;;  %p4649_p6 = scmp.eq.s32.totalorder %s3297_s15, 0 }
  0xc7   : > { %p62_p8 = scmp.ne.s32.totalorder %s3273_s9, %s3269_s30  ;;  %p4648_p9 = scmp.lt.s32.totalorder %s3297_s15, 4 }
  0xc8   : > { %s336_s23 = sand.u32 1, %s3277_s10   ;;  %p58_p1 = por %p4649_p6, %p56_p7 }
  0xc9   : > { %p4678_p3 = scmp.ne.s32.totalorder %s4667_s17, 0  ;;  %s2428_s1 = sshll.u32 %s336_s23, 8 }
  0xca   : > { %s2569_s12 = sshll.u32 %s3293_s14, 12  ;;  %s4680_s0 = sld [smem:[#allocation30_spill]] }
  0xcb   : > { %p3572_p10 = por %p4678_p3, %p62_p8  ;;  %s340_s30 = scalar_lea.vmem [#allocation3], %s2428_s1 }
  0xcc   : > { %s347_s26 = sshll.u32 %s340_s30, 4  ;;  %p3586_p5 = pnand %p4648_p9, %p58_p1  ;;  %s3582_s26 = int_to_ptr.vmem [resolvable:$true] %s347_s26 }
  0xcd   : > { %s4679_s21 = scalar_select %p3572_p10, 1, 0 }
  0xce   : > { %s3590_s8 = scalar_lea.sflag [#allocation4], %s336_s23  ;;  %p3101_p12 = pneg %p3586_p5 }
  0xd0   : > { %s3580_s16 = scalar_lea.hbm %s4680_s0, %s2569_s12  ;;  %s3104_s7 = scalar_lea.hbm %s4680_s0, 8192 }
  0xd1   : > { %s3099_s22 = scalar_lea.hbm %s3580_s16, 4096  ;;  %p3105_p2 = scmp.lt.u32.totalorder %s3580_s16, %s4680_s0 }
  0xd2   : > { %p3100_p11 = scmp.ne.s32.totalorder %s3580_s16, %s3099_s22  ;;  %p3106_p4 = scmp.lt.u32.totalorder %s3104_s7, %s3099_s22 }
  0xd3   : > { %p3108_p8 = scmp.lt.u32.totalorder %s3099_s22, %s3580_s16 }
  0xd4   : > { %p3102_p13 = pnand %p3101_p12, %p3100_p11  ;;  %p3107_p7 = por %p3106_p4, %p3105_p2 }
  0xd6   : > { %p3103_p0 = pneg %p3102_p13  ;;  %p3109_p1 = por %p3108_p8, %p3107_p7 }
  0xd8   : > { %p3110_p9 = pnand %p3109_p1, %p3103_p0 }
  0xda   : > { %3113 = shalt.err (!%p3110_p9)
}
  0xdb   : > { %s3114_s23 = scalar_lea.vmem %s3582_s26, 4096  ;;  %s3307_s12 = smov [#allocation3]  }
  0xdc   : > { %p3115_p11 = scmp.ne.s32.totalorder %s3582_s26, %s3114_s23  ;;  %s3119_s19 = sshll.u32 %s3307_s12, 4  ;;  %s3120_s19 = int_to_ptr.vmem [resolvable:$false] %s3119_s19 }
  0xdd   : > { %s3121_s24 = scalar_lea.vmem %s3120_s19, 8192  ;;  %p3122_p10 = scmp.lt.s32.totalorder %s3582_s26, %s3120_s19 }
  0xde   : > { %p3117_p13 = pnand %p3115_p11, %p3101_p12  ;;  %p3123_p2 = scmp.lt.s32.totalorder %s3121_s24, %s3114_s23 }
  0xe0   : > { %p3118_p6 = pneg %p3117_p13  ;;  %p3124_p4 = por %p3123_p2, %p3122_p10 }
  0xe2   : > { %p3125_p7 = pnand %p3124_p4, %p3118_p6 }
  0xe4   : > { %3128 = shalt.err (!%p3125_p7)
}
  0xe5   : > { %s3308_s30 = smov 128   ;;  %s3309_s22 = smov 8  }
  0xe6   : > { %2806 = dma.hbm_to_vmem [thread:$0]  (!%p3586_p5), %s3580_s16, 4096, %s3582_s26, %s3590_s8, %s3308_s30, %s3308_s30, %s3309_s22  }
  0xe7   : > { %s49_s25 = sadd.s32 1, %s3277_s10  ;;  %s2419_s11 = sadd.s32 4294967294, %s3297_s15  }
  0xe8   : > { %s39_s7 = sadd.s32 1, %s3289_s13  ;;  %s42_s18 = sadd.s32 1, %s3293_s14 }
  0xe9   : > { %p40_p6 = scmp.ge.s32.totalorder %s39_s7, 2  ;;  %s203_s1 = sadd.s32 1, %s3265_s29 }
  0xea   : > { %p216_p9 = scmp.ne.s32.totalorder %s3261_s28, %s3257_s27  ;;  %p210_p10 = scmp.ne.s32.totalorder %s3265_s29, %s3261_s28 }
  0xeb   : > { %s4730_s7 = smov (%p40_p6, %s39_s7), 0  ;;  %s4732_s18 = smov (!%p40_p6, %s42_s18), %s3293_s14 }
  0xec   : > { %4682 = sst [smem:[#allocation27_spill]] %s4730_s7  ;;  %s199_s23 = ssub.s32 %s3289_s13, %s4730_s7 }
  0xed   : > { %p44_p12 = scmp.ge.s32.totalorder %s4732_s18, 2  ;;  %p3634_p5 = por %p216_p9, %p4678_p3 }
  0xee   : > { %s4684_s26 = sadd.s32 4294967295, %s3297_s15   ;;  %p248_p8 = scmp.eq.s32.totalorder %s2419_s11, 3 }
  0xef   : > { %p242_p0 = scmp.eq.s32.totalorder %s4684_s26, 3  ;;  %s4734_s18 = smov (%p44_p12, %s4732_s18), 0 }
  0xf0   : > { %4685 = sst [smem:[#allocation28_spill]] %s4734_s18  ;;  %p3646_p11 = por %p248_p8, %p216_p9 }
  0xf1   : > { %p3642_p1 = por %p242_p0, %p210_p10  ;;  %s46_s12 = ssub.s32 %s3293_s14, %s4734_s18 }
  0xf2   : > { %s4687_s8 = scalar_select %p3646_p11, 1, 0 }
  0xf3   : > { %s4686_s20 = scalar_select %p3642_p1, 1, 0 }
  0xf4   : > { %4688 = sst [smem:[#allocation29_spill]] %s4687_s8  ;;  %p4689_p3 = scmp.eq.s32.totalorder %s3297_s15, 0 }
  0xf5   : > { %p47_p2 = scmp.eq.s32.totalorder %s46_s12, 0  ;;  %s200_s24 = sor.u32 %s199_s23, %s46_s12 }
  0xf6   : > { %p3654_p13 = por %p210_p10, %p4689_p3  ;;  %p201_p4 = scmp.eq.s32.totalorder %s200_s24, 0 }
  0xf7   : > { %s357_s30 = sand.u32 1, %s3265_s29   ;;  %s2432_s0 = sshll.u32 %s3293_s14, 1 }
  0xf8   : > { %s3660_s22 = scalar_select %p47_p2, %s3277_s10, %s49_s25  }
  0xf9   : > { %s3663_s11 = scalar_select %p201_p4, %s3265_s29, %s203_s1  }
  0xfa   : > { %s2431_s26 = sshll.u32 %s357_s30, 2  ;;  %s366_s2 = sadd.s32 %s3289_s13, %s2432_s0 }
  0xfb   : > { %s2433_s3 = sshll.u32 %s366_s2, 6  ;;  %s361_s4 = scalar_lea.vmem [#allocation15], %s2431_s26 }
  0xfc   : > { %s370_s5 = sshll.u32 %s361_s4, 4  ;;  %s4691_s7 = sld [smem:[#allocation37_spill]]  ;;  %s3672_s5 = int_to_ptr.vmem [resolvable:$true] %s370_s5 }
  0xfd   : > { %p4692_p7 = scmp.lt.s32.totalorder %s3297_s15, 4  ;;  %s358_s0 = scalar_lea.sflag [#allocation16], %s357_s30 }
  0xff   : > { %p3678_p6 = pnand %p4692_p7, %p3654_p13 }
 0x101   : > { %p3131_p10 = pneg %p3678_p6 }
 0x102   : > { %s3670_s8 = scalar_lea.hbm %s4691_s7, %s2433_s3  ;;  %s3134_s6 = scalar_lea.hbm %s4691_s7, 256 }
 0x103   : > { %s3129_s2 = scalar_lea.hbm %s3670_s8, 64  ;;  %p3135_p8 = scmp.lt.u32.totalorder %s3670_s8, %s4691_s7 }
 0x104   : > { %p3130_p9 = scmp.ne.s32.totalorder %s3670_s8, %s3129_s2  ;;  %p3136_p3 = scmp.lt.u32.totalorder %s3134_s6, %s3129_s2 }
 0x105   : > { %p3138_p2 = scmp.lt.u32.totalorder %s3129_s2, %s3670_s8 }
 0x106   : > { %p3132_p12 = pnand %p3131_p10, %p3130_p9  ;;  %p3137_p13 = por %p3136_p3, %p3135_p8 }
 0x108   : > { %p3133_p0 = pneg %p3132_p12  ;;  %p3139_p4 = por %p3138_p2, %p3137_p13 }
 0x10a   : > { %p3140_p7 = pnand %p3139_p4, %p3133_p0 }
 0x10c   : > { %3143 = shalt.err (!%p3140_p7)
}
 0x10d   : > { %s3144_s23 = scalar_lea.vmem %s3672_s5, 64  ;;  %s3310_s12 = smov [#allocation15]  }
 0x10e   : > { %p3145_p9 = scmp.ne.s32.totalorder %s3672_s5, %s3144_s23  ;;  %s3149_s19 = sshll.u32 %s3310_s12, 4  ;;  %s3150_s19 = int_to_ptr.vmem [resolvable:$false] %s3149_s19 }
 0x10f   : > { %s3151_s24 = scalar_lea.vmem %s3150_s19, 128  ;;  %p3152_p1 = scmp.lt.s32.totalorder %s3672_s5, %s3150_s19 }
 0x110   : > { %p3147_p12 = pnand %p3145_p9, %p3131_p10  ;;  %p3153_p8 = scmp.lt.s32.totalorder %s3151_s24, %s3144_s23 }
 0x112   : > { %p3148_p11 = pneg %p3147_p12  ;;  %p3154_p3 = por %p3153_p8, %p3152_p1 }
 0x114   : > { %p3155_p13 = pnand %p3154_p3, %p3148_p11 }
 0x116   : > { %3158 = shalt.err (!%p3155_p13)
}
 0x117   : > { %2809 = dma.hbm_to_vmem [thread:$0]  (!%p3678_p6), %s3670_s8, 64, %s3672_s5, %s358_s0  }
 0x118   : > { %s4694_s30 = sld [smem:[#allocation26_spill]] }
 0x11e   : > { %p4695_p0 = scmp.ne.s32.totalorder %s4694_s30, 0 }
 0x11f   : > { %s381_s26 = sand.u32 (!%p4695_p0), 1, %s3273_s9   ;;  %p4696_p10 = scmp.ne.s32.totalorder (!%p4695_p0), %s4679_s21, 0 }
 0x120   : > { %379 = sbr.rel (%p4695_p0) target bundleno = 897 (0x381), region = 52  ;;  %s2435_s2 = sshll.u32 (!%p4695_p0), %s381_s26, 8 }
 0x121   : > { %s382_s3 = scalar_lea.sflag (!%p4695_p0), [#allocation4], %s381_s26  ;;  %s3710_s4 = scalar_lea.vmem (!%p4695_p0), [#allocation3], %s2435_s2 }
 0x127   : > { %3232 = dma.done.wait (%p4696_p10), %s382_s3, 4096  }
 0x128   : > { %3234 = vsyncadd (%p4696_p10), %s382_s3, 4294963200  ;;  %p4697_p1 = scmp.ne.s32.totalorder %s4667_s17, 0 }
 0x12a   : > { %3236 = dma.done.wait (%p4697_p1), [#allocation7], 80  }
 0x12b   : > { %3238 = vsyncadd (%p4697_p1), [#allocation7], 4294967216 }
 0x12c   : > { %3240 = dma.done.wait (%p4697_p1), [#allocation10], 208  }
 0x12d   : > { %3242 = vsyncadd (%p4697_p1), [#allocation10], 4294967088 }
 0x12e   : > { %3244 = dma.done.wait (%p4697_p1), [#allocation13], 128  }
 0x12f   : > { %3246 = vsyncadd (%p4697_p1), [#allocation13], 4294967168  ;;  %s3729_s5 = sand.u32 1, %s3261_s28  }
 0x130   : > { %s4655_s21 = sshll.u32 %s3729_s5, 2  ;;  %s415_s8 = scalar_lea.sflag [#allocation16], %s3729_s5 }
 0x131   : > { %s3735_s25 = scalar_lea.vmem [#allocation15], %s4655_s21 }
 0x132   : > { %3248 = dma.done.wait (%p3634_p5), %s415_s8, 64  }
 0x133   : > { %3250 = vsyncadd (%p3634_p5), %s415_s8, 4294967232  ;;  %s4698_s0 = sld [smem:[#allocation24_spill]]  ;;  %vm456_vm0 = vcmask 195584   ;;  %v3311_v0 = vmov 0.0   ;;  %vm459_vm1 = vcmask 189440   ;;  %vm519_vm2 = vcmask 1043456  }
 0x134   : > { %458 = vst.msk [vmem:[#allocation2 + $0x8] sm:$0xff] %vm456_vm0, %v3311_v0  ;;  %457 = vst.msk [vmem:[#allocation2] sm:$0xff] %vm456_vm0, %v3311_v0  ;;  %v3820_v1 = vld [vmem:[#allocation6] sm:$0xf]  ;;  %vm512_vm3 = vcmask 31744   ;;  %v3312_v22 = vmov 0.0|0.0   ;;  %v1580_v24 = vlaneseq }
 0x135   : > { %461 = vst.msk [vmem:[#allocation2 + $0x18] sm:$0xff] %vm456_vm0, %v3311_v0  ;;  %462 = vst.msk [vmem:[#allocation2 + $0x20] sm:$0xff] %vm456_vm0, %v3311_v0  ;;  %2637 = vmatprep.subr.msk.mxu1 %vm519_vm2, %v3820_v1  ;;  %2722 = vmatprep.subr.bf16.mxu0 %v3312_v22  ;;  %v3990_v23 = vld [vmem:[#allocation8] ss:$0 sm:$0xff]  ;;  %vm3313_vm4 = vmmov 0   ;;  %v3314_v38 = vmov 0  }
 0x136   : > { %464 = vst.msk [vmem:[#allocation2 + $0x30] sm:$0xff] %vm456_vm0, %v3311_v0  ;;  %465 = vst.msk [vmem:[#allocation2 + $0x38] sm:$0xff] %vm456_vm0, %v3311_v0  ;;  %2638 = vmatpush3.msk.msra.mxu1 %vm519_vm2, %v3820_v1  ;;  %2719 = vmatprep.mubr.msk.f32.mxu0 %vm3313_vm4, %v3311_v0  ;;  %v1581_v29 = vshrl.u32 %v1580_v24, 7  ;;  %v2087_v34 = vld [vmem:[#allocation14] sm:$0xf] }
 0x137   : > { %467 = vst.msk [vmem:[#allocation2 + $0x48] sm:$0xff] %vm456_vm0, %v3311_v0  ;;  %468 = vst.msk [vmem:[#allocation2 + $0x50] sm:$0xff] %vm456_vm0, %v3311_v0  ;;  %2642 = vmatprep.subr.msk.mxu1 %vm519_vm2, %v3820_v1  ;;  %2930 = vset.pattern.permute.xlu0 %v3314_v38  ;;  %v1560_v45 = vld [vmem:[#allocation9] sm:$0x7]  ;;  %v1561_v54 = vld [vmem:[#allocation9 + $0x4] sm:$0x7] }
 0x138   : > { %470 = vst.msk [vmem:[#allocation2 + $0x60] sm:$0xff] %vm456_vm0, %v3311_v0  ;;  %471 = vst.msk [vmem:[#allocation2 + $0x68] sm:$0xff] %vm456_vm0, %v3311_v0  ;;  %v1634_v41 = vsub.s32 1, %v1581_v29  ;;  %v1686_v42 = vsub.s32 2, %v1581_v29  ;;  %2090 = vperm.xlu0 %2930, %v2087_v34   ;;  %v1582_v46 = vsub.s32 0, %v1581_v29 }
 0x139   : > { %s3742_s17 = sshll.u32 %s4698_s0, 3  ;;  %473 = vst.msk [vmem:[#allocation2 + $0x78] sm:$0xff] %vm456_vm0, %v3311_v0  ;;  %474 = vst.msk [vmem:[#allocation2 + $0x80] sm:$0xff] %vm456_vm0, %v3311_v0  ;;  %v1562_v61 = vld [vmem:[#allocation9 + $0x8] sm:$0x7] }
 0x13a   : > { %s3745_s6 = sadd.s32 4294967295, %s3742_s17  ;;  %p613_p11 = scmp.gt.s32.totalorder %s3742_s17, 0  ;;  %476 = vst.msk [vmem:[#allocation2 + $0x90] sm:$0xff] %vm456_vm0, %v3311_v0  ;;  %477 = vst.msk [vmem:[#allocation2 + $0x98] sm:$0xff] %vm456_vm0, %v3311_v0  ;;  %v4066_v58 = vrot.slane %v1560_v45, %v1634_v41  ;;  %v4073_v62 = vrot.slane %v1560_v45, %v1582_v46  ;;  %v4075_v63 = vrot.slane %v1560_v45, %v1686_v42 }
 0x13b   : > { %479 = vst.msk [vmem:[#allocation2 + $0xa8] sm:$0xff] %vm456_vm0, %v3311_v0  ;;  %480 = vst.msk [vmem:[#allocation2 + $0xb0] sm:$0xff] %vm456_vm0, %v3311_v0  ;;  %p498_p5 = scmp.gt.s32.totalorder %s3745_s6, 0  ;;  %p2446_p6 = scmp.lt.s32.totalorder %s3745_s6, 15 }
 0x13c   : > { %482 = vst.msk [vmem:[#allocation2 + $0xc0] sm:$0xff] %vm456_vm0, %v3311_v0  ;;  %483 = vst.msk [vmem:[#allocation2 + $0xc8] sm:$0xff] %vm456_vm0, %v3311_v0  ;;  %s614_s16 = scalar_select %p613_p11, %s3742_s17, 0 }
 0x13d   : > { %485 = vst.msk [vmem:[#allocation2 + $0xd8] sm:$0xff] %vm456_vm0, %v3311_v0  ;;  %486 = vst.msk [vmem:[#allocation2 + $0xe0] sm:$0xff] %vm456_vm0, %v3311_v0  ;;  %s499_s18 = scalar_select %p498_p5, %s3745_s6, 0 }
 0x13e   : > { %460 = vst.msk [vmem:[#allocation2 + $0x10] sm:$0x3] %vm459_vm1, %v3311_v0  ;;  %463 = vst.msk [vmem:[#allocation2 + $0x28] sm:$0x3] %vm459_vm1, %v3311_v0  ;;  %p2457_p2 = scmp.lt.s32.totalorder %s3742_s17, 15  ;;  %s3816_s1 = sadd.s32 1, %s3742_s17 }
 0x13f   : > { %466 = vst.msk [vmem:[#allocation2 + $0x40] sm:$0x3] %vm459_vm1, %v3311_v0  ;;  %469 = vst.msk [vmem:[#allocation2 + $0x58] sm:$0x3] %vm459_vm1, %v3311_v0  ;;  %s4736_s18 = smov (!%p2446_p6, %s499_s18), 15  ;;  %p719_p4 = scmp.gt.s32.totalorder %s3816_s1, 0 }
 0x140   : > { %472 = vst.msk [vmem:[#allocation2 + $0x70] sm:$0x3] %vm459_vm1, %v3311_v0  ;;  %475 = vst.msk [vmem:[#allocation2 + $0x88] sm:$0x3] %vm459_vm1, %v3311_v0  ;;  %s4738_s16 = smov (!%p2457_p2, %s614_s16), 15  ;;  %s2451_s23 = sshll.u32 %s4736_s18, 4 }
 0x141   : > { %478 = vst.msk [vmem:[#allocation2 + $0xa0] sm:$0x3] %vm459_vm1, %v3311_v0  ;;  %481 = vst.msk [vmem:[#allocation2 + $0xb8] sm:$0x3] %vm459_vm1, %v3311_v0  ;;  %s503_s12 = scalar_lea.vmem %s3710_s4, %s2451_s23 [#allocation3]  ;;  %s2462_s19 = sshll.u32 %s4738_s16, 4 }
 0x142   : > { %484 = vst.msk [vmem:[#allocation2 + $0xd0] sm:$0x3] %vm459_vm1, %v3311_v0  ;;  %487 = vst.msk [vmem:[#allocation2 + $0xe8] sm:$0x3] %vm459_vm1, %v3311_v0  ;;  %v504_v2 = vld [vmem:[%s503_s12] sm:$0xff]  ;;  %v505_v3 = vld [vmem:[%s503_s12 + $0x8] sm:$0xff]  ;;  %s618_s24 = scalar_lea.vmem %s3710_s4, %s2462_s19 [#allocation3] }
 0x143   : > { %p2467_p7 = scmp.lt.s32.totalorder %s3816_s1, 15  ;;  %2639 = vmatprep.mubr.msk.f32.mxu1 %vm512_vm3, %v504_v2  ;;  %v619_v4 = vld [vmem:[%s618_s24] sm:$0xff]  ;;  %s3836_s26 = sadd.s32 2, %s3742_s17  ;;  %v620_v5 = vld [vmem:[%s618_s24 + $0x8] sm:$0xff]  ;;  %vm4227_vm5 = vmpackc.low %vm456_vm0, %vm456_vm0 }
 0x144   : > { %s720_s30 = scalar_select %p719_p4, %s3816_s1, 0  ;;  %2640 = vmatmul.mubr.msk.f32.vlgmr.msra.gmra.mrb[0].mxu1 %vm512_vm3, %v505_v3  ;;  %v4085_v3 = vrot.slane %v1561_v54, %v1634_v41 }
 0x145   : > { %s3839_s2 = sadd.s32 3, %s3742_s17  ;;  %2643 = vmatpush3.msk.msra.mxu1 %vm519_vm2, %v3820_v1  ;;  %2644 = vmatprep.mubr.msk.f32.mxu1 %vm512_vm3, %v619_v4  ;;  %p825_p9 = scmp.gt.s32.totalorder %s3836_s26, 0 }
 0x146   : > { %s4740_s30 = smov (!%p2467_p7, %s720_s30), 15  ;;  %2647 = vmatprep.subr.msk.mxu1 %vm519_vm2, %v3820_v1  ;;  %p2477_p12 = scmp.lt.s32.totalorder %s3836_s26, 15 }
 0x147   : > { %s2472_s3 = sshll.u32 %s4740_s30, 4  ;;  %p931_p8 = scmp.gt.s32.totalorder %s3839_s2, 0 }
 0x148   : > { %2645 = vmatmul.mubr.msk.f32.vlgmr.msra.gmra.mrb[2].mxu1 %vm512_vm3, %v620_v5  ;;  %s724_s8 = scalar_lea.vmem %s3710_s4, %s2472_s3 [#allocation3]  ;;  %p2487_p3 = scmp.lt.s32.totalorder %s3839_s2, 15 }
 0x149   : > { %2648 = vmatpush3.msk.msra.mxu1 %vm519_vm2, %v3820_v1  ;;  %v725_v6 = vld [vmem:[%s724_s8] sm:$0xff]  ;;  %v726_v7 = vld [vmem:[%s724_s8 + $0x8] sm:$0xff]  ;;  %s826_s16 = scalar_select %p825_p9, %s3836_s26, 0 }
 0x14a   : > { %2649 = vmatprep.mubr.msk.f32.mxu1 %vm512_vm3, %v725_v6  ;;  %2652 = vmatprep.subr.msk.mxu1 %vm519_vm2, %v3820_v1  ;;  %s932_s18 = scalar_select %p931_p8, %s3839_s2, 0 }
 0x14b   : > { %s4742_s16 = smov (!%p2477_p12, %s826_s16), 15  ;;  %s3863_s12 = sadd.s32 4, %s3742_s17 }
 0x14c   : > { %2650 = vmatmul.mubr.msk.f32.vlgmr.msra.gmra.mrb[4].mxu1 %vm512_vm3, %v726_v7  ;;  %s4744_s18 = smov (!%p2487_p3, %s932_s18), 15  ;;  %s2482_s23 = sshll.u32 %s4742_s16, 4  ;;  %v4089_v7 = vrot.slane %v1561_v54, %v1582_v46 }
 0x14d   : > { %2653 = vmatpush3.msk.msra.mxu1 %vm519_vm2, %v3820_v1  ;;  %s830_s19 = scalar_lea.vmem %s3710_s4, %s2482_s23 [#allocation3]  ;;  %s2492_s24 = sshll.u32 %s4744_s18, 4 }
 0x14e   : > { %2657 = vmatprep.subr.msk.mxu1 %vm519_vm2, %v3820_v1  ;;  %v831_v8 = vld [vmem:[%s830_s19] sm:$0xff]  ;;  %v832_v9 = vld [vmem:[%s830_s19 + $0x8] sm:$0xff]  ;;  %s936_s30 = scalar_lea.vmem %s3710_s4, %s2492_s24 [#allocation3]  ;;  %p1037_p13 = scmp.gt.s32.totalorder %s3863_s12, 0 }
 0x14f   : > { %2654 = vmatprep.mubr.msk.f32.mxu1 %vm512_vm3, %v831_v8  ;;  %v937_v10 = vld [vmem:[%s936_s30] sm:$0xff]  ;;  %p2497_p0 = scmp.lt.s32.totalorder %s3863_s12, 15  ;;  %s3873_s3 = sadd.s32 5, %s3742_s17  ;;  %v938_v11 = vld [vmem:[%s936_s30 + $0x8] sm:$0xff]  ;;  %v4091_v8 = vrot.slane %v1561_v54, %v1686_v42 }
 0x150   : > { %2655 = vmatmul.mubr.msk.f32.vlgmr.msra.gmra.mrb[6].mxu1 %vm512_vm3, %v832_v9  ;;  %s1038_s8 = scalar_select %p1037_p13, %s3863_s12, 0 }
 0x151   : > { %2658 = vmatpush3.msk.msra.mxu1 %vm519_vm2, %v3820_v1  ;;  %2659 = vmatprep.mubr.msk.f32.mxu1 %vm512_vm3, %v937_v10  ;;  %p1143_p10 = scmp.gt.s32.totalorder %s3873_s3, 0  ;;  %p2507_p1 = scmp.lt.s32.totalorder %s3873_s3, 15 }
 0x152   : > { %2662 = vmatprep.subr.msk.mxu1 %vm519_vm2, %v3820_v1  ;;  %s4746_s8 = smov (!%p2497_p0, %s1038_s8), 15  ;;  %s3887_s23 = sadd.s32 6, %s3742_s17 }
 0x153   : > { %s1144_s16 = scalar_select %p1143_p10, %s3873_s3, 0 }
 0x154   : > { %2660 = vmatmul.mubr.msk.f32.vlgmr.msra.gmra.mrb[8].mxu1 %vm512_vm3, %v938_v11  ;;  %s2502_s18 = sshll.u32 %s4746_s8, 4  ;;  %p1249_p11 = scmp.gt.s32.totalorder %s3887_s23, 0 }
 0x155   : > { %2663 = vmatpush3.msk.msra.mxu1 %vm519_vm2, %v3820_v1  ;;  %s1042_s19 = scalar_lea.vmem %s3710_s4, %s2502_s18 [#allocation3]  ;;  %s4748_s16 = smov (!%p2507_p1, %s1144_s16), 15 }
 0x156   : > { %v1043_v12 = vld [vmem:[%s1042_s19] sm:$0xff]  ;;  %v1044_v13 = vld [vmem:[%s1042_s19 + $0x8] sm:$0xff]  ;;  %2667 = vmatprep.subr.msk.mxu1 %vm519_vm2, %v3820_v1  ;;  %s1250_s24 = scalar_select %p1249_p11, %s3887_s23, 0 }
 0x157   : > { %2664 = vmatprep.mubr.msk.f32.mxu1 %vm512_vm3, %v1043_v12  ;;  %s2512_s30 = sshll.u32 %s4748_s16, 4  ;;  %p2517_p5 = scmp.lt.s32.totalorder %s3887_s23, 15  ;;  %v4099_v12 = vrot.slane %v1562_v61, %v1582_v46 }
 0x158   : > { %2665 = vmatmul.mubr.msk.f32.vlgmr.msra.gmra.mrb[10].mxu1 %vm512_vm3, %v1044_v13  ;;  %s1148_s8 = scalar_lea.vmem %s3710_s4, %s2512_s30 [#allocation3]  ;;  %s3903_s18 = sadd.s32 7, %s3742_s17  ;;  %v4101_v13 = vrot.slane %v1562_v61, %v1634_v41 }
 0x159   : > { %2668 = vmatpush3.msk.msra.mxu1 %vm519_vm2, %v3820_v1  ;;  %v1149_v14 = vld [vmem:[%s1148_s8] sm:$0xff]  ;;  %v1150_v15 = vld [vmem:[%s1148_s8 + $0x8] sm:$0xff]  ;;  %s4750_s24 = smov (!%p2517_p5, %s1250_s24), 15  ;;  %p1355_p6 = scmp.gt.s32.totalorder %s3903_s18, 0 }
 0x15a   : > { %2672 = vmatprep.subr.msk.mxu1 %vm519_vm2, %v3820_v1  ;;  %2669 = vmatprep.mubr.msk.f32.mxu1 %vm512_vm3, %v1149_v14  ;;  %p2527_p2 = scmp.lt.s32.totalorder %s3903_s18, 15  ;;  %s2522_s16 = sshll.u32 %s4750_s24, 4 }
 0x15b   : > { %s3912_s19 = sadd.s32 8, %s3742_s17  ;;  %s1254_s30 = scalar_lea.vmem %s3710_s4, %s2522_s16 [#allocation3] }
 0x15c   : > { %2670 = vmatmul.mubr.msk.f32.vlgmr.msra.gmra.mrb[12].mxu1 %vm512_vm3, %v1150_v15  ;;  %p1461_p4 = scmp.gt.s32.totalorder %s3912_s19, 0  ;;  %v1255_v16 = vld [vmem:[%s1254_s30] sm:$0xff]  ;;  %v1256_v17 = vld [vmem:[%s1254_s30 + $0x8] sm:$0xff]  ;;  %p2537_p7 = scmp.lt.s32.totalorder %s3912_s19, 15 }
 0x15d   : > { %2673 = vmatpush3.msk.msra.mxu1 %vm519_vm2, %v3820_v1  ;;  %s1356_s8 = scalar_select %p1355_p6, %s3903_s18, 0  ;;  %2674 = vmatprep.mubr.msk.f32.mxu1 %vm512_vm3, %v1255_v16 }
 0x15e   : > { %2677 = vmatprep.subr.msk.mxu1 %vm519_vm2, %v3820_v1  ;;  %s1462_s24 = scalar_select %p1461_p4, %s3912_s19, 0 }
 0x15f   : > { %s4752_s8 = smov (!%p2527_p2, %s1356_s8), 15  ;;  %p492_p9 = scmp.ge.s32.totalorder %s3745_s6, 0 }
 0x160   : > { %2675 = vmatmul.mubr.msk.f32.vlgmr.msra.gmra.mrb[14].mxu1 %vm512_vm3, %v1256_v17  ;;  %s2532_s16 = sshll.u32 %s4752_s8, 4  ;;  %s4754_s24 = smov (!%p2537_p7, %s1462_s24), 15  ;;  %v4105_v17 = vrot.slane %v1562_v61, %v1686_v42 }
 0x161   : > { %2678 = vmatpush3.msk.msra.mxu1 %vm519_vm2, %v3820_v1  ;;  %s1360_s30 = scalar_lea.vmem %s3710_s4, %s2532_s16 [#allocation3]  ;;  %s2542_s21 = sshll.u32 %s4754_s24, 4 }
 0x162   : > { %2682 = vmatprep.subr.msk.mxu1 %vm519_vm2, %v3820_v1  ;;  %v1361_v18 = vld [vmem:[%s1360_s30] sm:$0xff]  ;;  %v1362_v19 = vld [vmem:[%s1360_s30 + $0x8] sm:$0xff]  ;;  %s1466_s8 = scalar_lea.vmem %s3710_s4, %s2542_s21 [#allocation3]  ;;  %p493_p12 = scmp.lt.s32.totalorder %s3745_s6, 16 }
 0x163   : > { %2679 = vmatprep.mubr.msk.f32.mxu1 %vm512_vm3, %v1361_v18  ;;  %v1467_v20 = vld [vmem:[%s1466_s8] sm:$0xff]  ;;  %v1468_v21 = vld [vmem:[%s1466_s8 + $0x8] sm:$0xff]  ;;  %p607_p8 = scmp.ge.s32.totalorder %s3742_s17, 0  ;;  %p608_p3 = scmp.lt.s32.totalorder %s3742_s17, 16 }
 0x164   : > { %2680 = vmatmul.mubr.msk.f32.vlgmr.msra.gmra.mrb[16].mxu1 %vm512_vm3, %v1362_v19  ;;  %p3944_p13 = pnand %p493_p12, %p492_p9  ;;  %p713_p10 = scmp.ge.s32.totalorder %s3816_s1, 0 }
 0x165   : > { %2683 = vmatpush3.msk.msra.mxu1 %vm519_vm2, %v3820_v1  ;;  %2684 = vmatprep.mubr.msk.f32.mxu1 %vm512_vm3, %v1467_v20  ;;  %p3948_p0 = pnand %p608_p3, %p607_p8  ;;  %p714_p1 = scmp.lt.s32.totalorder %s3816_s1, 16 }
 0x166   : > { %s2445_s24 = scalar_select %p3944_p13, 0, 1 }
 0x167   : > { %s2456_s16 = scalar_select %p3948_p0, 0, 1 }
 0x168   : > { %2685 = vmatmul.mubr.msk.f32.vlgmr.msra.gmra.mrb[18].mxu1 %vm512_vm3, %v1468_v21  ;;  %p819_p11 = scmp.ge.s32.totalorder %s3836_s26, 0  ;;  %p820_p5 = scmp.lt.s32.totalorder %s3836_s26, 16 }
 0x169   : > { %p925_p6 = scmp.ge.s32.totalorder %s3839_s2, 0  ;;  %p926_p2 = scmp.lt.s32.totalorder %s3839_s2, 16 }
 0x16a   : > { %p1031_p4 = scmp.ge.s32.totalorder %s3863_s12, 0  ;;  %p1032_p7 = scmp.lt.s32.totalorder %s3863_s12, 16 }
 0x16b   : > { %p3964_p9 = pnand %p714_p1, %p713_p10  ;;  %p3968_p12 = pnand %p820_p5, %p819_p11 }
 0x16c   : > { %p3972_p8 = pnand %p926_p2, %p925_p6  ;;  %s3976_s26 = scvt.s32.f32 %s2445_s24 }
 0x16d   : > { %p3978_p3 = pnand %p1032_p7, %p1031_p4  ;;  %p1137_p13 = scmp.ge.s32.totalorder %s3873_s3, 0 }
 0x16e   : > { %s2466_s12 = scalar_select %p3964_p9, 0, 1  ;;  %v602_v31 = vstv %s3976_s26 }
 0x16f   : > { %s2476_s30 = scalar_select %p3968_p12, 0, 1 }
 0x170   : > { %s2486_s8 = scalar_select %p3972_p8, 0, 1 }
 0x171   : > { %s2496_s4 = scalar_select %p3978_p3, 0, 1 }
 0x172   : > { %p1138_p10 = scmp.lt.s32.totalorder %s3873_s3, 16  ;;  %p1243_p1 = scmp.ge.s32.totalorder %s3887_s23, 0 }
 0x173   : > { %p1244_p11 = scmp.lt.s32.totalorder %s3887_s23, 16  ;;  %p1349_p5 = scmp.ge.s32.totalorder %s3903_s18, 0 }
 0x174   : > { %p1350_p6 = scmp.lt.s32.totalorder %s3903_s18, 16  ;;  %p1455_p2 = scmp.ge.s32.totalorder %s3912_s19, 0 }
 0x175   : > { %p1456_p4 = scmp.lt.s32.totalorder %s3912_s19, 16  ;;  %s4006_s24 = scvt.s32.f32 %s2456_s16 }
 0x176   : > { %p4012_p7 = pnand %p1138_p10, %p1137_p13  ;;  %s4016_s6 = scvt.s32.f32 %s2466_s12 }
 0x177   : > { %p4022_p9 = pnand %p1244_p11, %p1243_p1  ;;  %s4027_s3 = scvt.s32.f32 %s2476_s30  ;;  %v706_v48 = vstv %s4006_s24 }
 0x178   : > { %p4033_p0 = pnand %p1350_p6, %p1349_p5  ;;  %s4041_s23 = scvt.s32.f32 %s2486_s8  ;;  %v812_v56 = vstv %s4016_s6 }
 0x179   : > { %p4047_p12 = pnand %p1456_p4, %p1455_p2  ;;  %s4071_s30 = scvt.s32.f32 %s2496_s4  ;;  %v918_v2 = vstv %s4027_s3 }
 0x17a   : > { %s2506_s18 = scalar_select %p4012_p7, 0, 1  ;;  %v1024_v6 = vstv %s4041_s23 }
 0x17b   : > { %s2516_s19 = scalar_select %p4022_p9, 0, 1  ;;  %v1130_v16 = vstv %s4071_s30 }
 0x17c   : > { %s2526_s1 = scalar_select %p4033_p0, 0, 1 }
 0x17d   : > { %s2536_s12 = scalar_select %p4047_p12, 0, 1 }
 0x17e   : > { %s4081_s8 = scvt.s32.f32 %s2506_s18  ;;  %s4083_s24 = scvt.s32.f32 %s2516_s19 }
 0x17f   : > { %s4093_s2 = scvt.s32.f32 %s2526_s1  ;;  %s4095_s4 = scvt.s32.f32 %s2536_s12 }
 0x180   : > { %v1236_v20 = vstv %s4081_s8  ;;  %v1342_v21 = vstv %s4083_s24  ;;  %s4711_s17 = sld [smem:[#allocation25_spill]]  ;;  %s4712_s16 = sshll.u32 %s3729_s5, 2 }
 0x181   : > { %s455_s23 = scalar_lea.vmem [#allocation17], %s4712_s16  ;;  %s4713_s1 = sld [smem:[#allocation38_spill]] }
 0x182   : > { %s2233_s26 = sshll.u32 %s455_s23, 4  ;;  %p4714_p3 = scmp.ne.s32.totalorder %s4686_s20, 0  ;;  %s4569_s26 = int_to_ptr.vmem [resolvable:$true] %s2233_s26 }
 0x183   : > { %s3315_s30 = smov [#allocation17]  }
 0x184   : > { %s3163_s8 = sshll.u32 %s3315_s30, 4  ;;  %s3164_s8 = int_to_ptr.vmem [resolvable:$false] %s3163_s8 }
 0x185   : > { %s3165_s24 = scalar_lea.vmem %s3164_s8, 128  ;;  %p3166_p1 = scmp.lt.s32.totalorder %s4569_s26, %s3164_s8 }
 0x186   : > { %s2565_s6 = sshll.u32 %s4711_s17, 1 }
 0x187   : > { %s2229_s21 = sadd.s32 %s4698_s0, %s2565_s6  ;;  %s2218_s0 = scalar_lea.sflag [#allocation5], %s3729_s5 }
 0x188   : > { %s2566_s3 = sshll.u32 %s2229_s21, 6 }
 0x189   : > { %s4567_s12 = scalar_lea.hbm %s4713_s1, %s2566_s3 }
 0x217   : > { %v2641_v25 = vpop.f32.mrb[0].mxu1 }
 0x218   : > { %v595_v26 = vadd.f32 %v2641_v25, %v3990_v23  ;;  %v589_v27 = vpop.f32.mrb[1].mxu1 }
 0x219   : > { %v590_v28 = vadd.f32 %v3990_v23, %v589_v27 }
 0x21a   : > { %v599_v30 = vmax.f32 %v595_v26, 0.0 }
 0x21b   : > { %v598_v32 = vmax.f32 %v590_v28, 0.0  ;;  %v2646_v33 = vpop.f32.mrb[2].mxu1 }
 0x21c   : > { %v601_v35 = vmin.f32 %v599_v30, 6.0  ;;  %v699_v36 = vadd.f32 %v2646_v33, %v3990_v23  ;;  %v693_v37 = vpop.f32.mrb[3].mxu1  ;;  %v1554_v33 = vstv %s4095_s4 }
 0x21d   : > { %v600_v39 = vmin.f32 %v598_v32, 6.0  ;;  %v694_v40 = vadd.f32 %v3990_v23, %v693_v37  ;;  %v1448_v32 = vstv %s4093_s2 }
 0x21e   : > { %v604_v43 = vmul.f32 %v602_v31, %v601_v35  ;;  %v703_v44 = vmax.f32 %v699_v36, 0.0 }
 0x21f   : > { %v603_v47 = vmul.f32 %v602_v31, %v600_v39  ;;  %v702_v49 = vmax.f32 %v694_v40, 0.0  ;;  %v2651_v50 = vpop.f32.mrb[4].mxu1 }
 0x220   : > { %606 = vst.msk [vmem:[#allocation2 + $0x9] sm:$0xff] %vm456_vm0, %v604_v43  ;;  %v705_v51 = vmin.f32 %v703_v44, 6.0  ;;  %v805_v52 = vadd.f32 %v2651_v50, %v3990_v23  ;;  %v799_v53 = vpop.f32.mrb[5].mxu1 }
 0x221   : > { %605 = vst.msk [vmem:[#allocation2 + $0x1] sm:$0xff] %vm456_vm0, %v603_v47  ;;  %v704_v55 = vmin.f32 %v702_v49, 6.0  ;;  %v800_v57 = vadd.f32 %v3990_v23, %v799_v53 }
 0x222   : > { %v708_v59 = vmul.f32 %v706_v48, %v705_v51  ;;  %v809_v60 = vmax.f32 %v805_v52, 0.0 }
 0x223   : > { %v707_v0 = vmul.f32 %v706_v48, %v704_v55  ;;  %v808_v1 = vmax.f32 %v800_v57, 0.0  ;;  %v2656_v5 = vpop.f32.mrb[6].mxu1 }
 0x224   : > { %711 = vst.msk [vmem:[#allocation2 + $0x21] sm:$0xff] %vm456_vm0, %v708_v59  ;;  %v811_v4 = vmin.f32 %v809_v60, 6.0  ;;  %v911_v10 = vadd.f32 %v2656_v5, %v3990_v23  ;;  %v905_v11 = vpop.f32.mrb[7].mxu1 }
 0x225   : > { %710 = vst.msk [vmem:[#allocation2 + $0x19] sm:$0xff] %vm456_vm0, %v707_v0  ;;  %v810_v9 = vmin.f32 %v808_v1, 6.0  ;;  %v906_v15 = vadd.f32 %v3990_v23, %v905_v11 }
 0x226   : > { %v814_v14 = vmul.f32 %v812_v56, %v811_v4  ;;  %v915_v19 = vmax.f32 %v911_v10, 0.0 }
 0x227   : > { %v813_v18 = vmul.f32 %v812_v56, %v810_v9  ;;  %v1617_v24 = vld [vmem:[#allocation2 + $0x9] sm:$0xff]  ;;  %v914_v26 = vmax.f32 %v906_v15, 0.0  ;;  %v2661_v27 = vpop.f32.mrb[8].mxu1 }
 0x228   : > { %v1669_v25 = vld [vmem:[#allocation2 + $0xa] sm:$0xff]  ;;  %817 = vst.msk [vmem:[#allocation2 + $0x39] sm:$0xff] %vm456_vm0, %v814_v14  ;;  %v1564_v28 = vld [vmem:[#allocation2] sm:$0xff]  ;;  %v1637_v31 = vmul.f32 %v4066_v58, %v1617_v24  ;;  %v917_v34 = vmin.f32 %v915_v19, 6.0  ;;  %v1017_v35 = vadd.f32 %v2661_v27, %v3990_v23  ;;  %v1011_v36 = vpop.f32.mrb[9].mxu1 }
 0x229   : > { %v1565_v29 = vld [vmem:[#allocation2 + $0x8] sm:$0xff]  ;;  %816 = vst.msk [vmem:[#allocation2 + $0x31] sm:$0xff] %vm456_vm0, %v813_v18  ;;  %v1584_v37 = vmul.f32 %v4073_v62, %v1564_v28  ;;  %v916_v40 = vmin.f32 %v914_v26, 6.0  ;;  %v1012_v41 = vadd.f32 %v3990_v23, %v1011_v36  ;;  %v1689_v43 = vmul.f32 %v4075_v63, %v1669_v25 }
 0x22a   : > { %v1616_v30 = vld [vmem:[#allocation2 + $0x1] sm:$0xff]  ;;  %v1585_v38 = vmul.f32 %v4073_v62, %v1565_v29  ;;  %v920_v44 = vmul.f32 %v918_v2, %v917_v34  ;;  %v1021_v45 = vmax.f32 %v1017_v35, 0.0 }
 0x22b   : > { %v1668_v39 = vld [vmem:[#allocation2 + $0x2] sm:$0xff]  ;;  %v1636_v42 = vmul.f32 %v4066_v58, %v1616_v30  ;;  %v919_v49 = vmul.f32 %v918_v2, %v916_v40  ;;  %v1020_v50 = vmax.f32 %v1012_v41, 0.0  ;;  %v2666_v51 = vpop.f32.mrb[10].mxu1 }
 0x22c   : > { %v1653_v46 = vadd.f32 %v1637_v31, %v1585_v38  ;;  %v1688_v47 = vmul.f32 %v4075_v63, %v1668_v39  ;;  %v4121_v48 = vld [vmem:[#allocation2 + $0x21] sm:$0xff]  ;;  %v4123_v53 = vld [vmem:[#allocation2 + $0x18] sm:$0xff]  ;;  %923 = vst.msk [vmem:[#allocation2 + $0x51] sm:$0xff] %vm456_vm0, %v920_v44  ;;  %v1023_v57 = vmin.f32 %v1021_v45, 6.0  ;;  %v1123_v59 = vadd.f32 %v2666_v51, %v3990_v23  ;;  %v1117_v60 = vpop.f32.mrb[11].mxu1 }
 0x22d   : > { %v1652_v52 = vadd.f32 %v1636_v42, %v1584_v37  ;;  %v4125_v54 = vld [vmem:[#allocation2 + $0x20] sm:$0xff]  ;;  %v1793_v56 = vmul.f32 %v4085_v3, %v4121_v48  ;;  %v1740_v0 = vmul.f32 %v4089_v7, %v4123_v53  ;;  %922 = vst.msk [vmem:[#allocation2 + $0x49] sm:$0xff] %vm456_vm0, %v919_v49  ;;  %v1022_v2 = vmin.f32 %v1020_v50, 6.0 }
 0x22e   : > { %v4127_v55 = vld [vmem:[#allocation2 + $0x19] sm:$0xff]  ;;  %v1705_v61 = vadd.f32 %v1689_v43, %v1653_v46  ;;  %v1118_v4 = vadd.f32 %v3990_v23, %v1117_v60  ;;  %v1741_v9 = vmul.f32 %v4089_v7, %v4125_v54  ;;  %v4141_v10 = vld [vmem:[#allocation2 + $0x22] sm:$0xff]  ;;  %v1026_v11 = vmul.f32 %v1024_v6, %v1023_v57 }
 0x22f   : > { %v4135_v1 = vld [vmem:[#allocation2 + $0x1a] sm:$0xff]  ;;  %v1704_v5 = vadd.f32 %v1688_v47, %v1652_v52  ;;  %v1127_v14 = vmax.f32 %v1123_v59, 0.0  ;;  %v1792_v15 = vmul.f32 %v4085_v3, %v4127_v55  ;;  %v1025_v19 = vmul.f32 %v1024_v6, %v1022_v2  ;;  %v2671_v25 = vpop.f32.mrb[12].mxu1 }
 0x230   : > { %v1844_v18 = vmul.f32 %v4091_v8, %v4135_v1  ;;  %v1126_v24 = vmax.f32 %v1118_v4, 0.0  ;;  %v1757_v27 = vadd.f32 %v1741_v9, %v1705_v61  ;;  %v4151_v28 = vld [vmem:[#allocation2 + $0x30] sm:$0xff]  ;;  %v4153_v29 = vld [vmem:[#allocation2 + $0x38] sm:$0xff]  ;;  %1029 = vst.msk [vmem:[#allocation2 + $0x69] sm:$0xff] %vm456_vm0, %v1026_v11  ;;  %v1229_v34 = vadd.f32 %v2671_v25, %v3990_v23  ;;  %v1223_v35 = vpop.f32.mrb[13].mxu1 }
 0x231   : > { %v1756_v26 = vadd.f32 %v1740_v0, %v1704_v5  ;;  %v4155_v30 = vld [vmem:[#allocation2 + $0x31] sm:$0xff]  ;;  %v1129_v31 = vmin.f32 %v1127_v14, 6.0  ;;  %v1845_v6 = vmul.f32 %v4091_v8, %v4141_v10  ;;  %v1896_v36 = vmul.f32 %v4099_v12, %v4151_v28  ;;  %1028 = vst.msk [vmem:[#allocation2 + $0x61] sm:$0xff] %vm456_vm0, %v1025_v19  ;;  %v4165_v41 = vld [vmem:[#allocation2 + $0x39] sm:$0xff] }
 0x232   : > { %v1128_v37 = vmin.f32 %v1126_v24, 6.0  ;;  %v1224_v38 = vadd.f32 %v3990_v23, %v1223_v35  ;;  %v1809_v40 = vadd.f32 %v1793_v56, %v1757_v27  ;;  %v4167_v42 = vld [vmem:[#allocation2 + $0x32] sm:$0xff]  ;;  %v1233_v44 = vmax.f32 %v1229_v34, 0.0  ;;  %v4177_v56 = vld [vmem:[#allocation2 + $0x3a] sm:$0xff]  ;;  %v4196_v27 = vld [vmem:[#allocation11] ss:$0 sm:$0xff] }
 0x233   : > { %v1808_v39 = vadd.f32 %v1792_v15, %v1756_v26  ;;  %v1132_v43 = vmul.f32 %v1130_v16, %v1129_v31  ;;  %v1897_v45 = vmul.f32 %v4099_v12, %v4153_v29  ;;  %v1948_v46 = vmul.f32 %v4101_v13, %v4155_v30  ;;  %v2676_v50 = vpop.f32.mrb[14].mxu1 }
 0x234   : > { %v1131_v47 = vmul.f32 %v1130_v16, %v1128_v37  ;;  %v1232_v49 = vmax.f32 %v1224_v38, 0.0  ;;  %v1861_v52 = vadd.f32 %v1845_v6, %v1809_v40  ;;  %v1235_v57 = vmin.f32 %v1233_v44, 6.0  ;;  %v1329_v60 = vpop.f32.mrb[15].mxu1 }
 0x235   : > { %v1860_v51 = vadd.f32 %v1844_v18, %v1808_v39  ;;  %1135 = vst.msk [vmem:[#allocation2 + $0x81] sm:$0xff] %vm456_vm0, %v1132_v43  ;;  %v1335_v59 = vadd.f32 %v2676_v50, %v3990_v23  ;;  %v1949_v61 = vmul.f32 %v4101_v13, %v4165_v41  ;;  %v2000_v16 = vmul.f32 %v4105_v17, %v4167_v42 }
 0x236   : > { %1134 = vst.msk [vmem:[#allocation2 + $0x79] sm:$0xff] %vm456_vm0, %v1131_v47  ;;  %v1234_v0 = vmin.f32 %v1232_v49, 6.0  ;;  %v1330_v2 = vadd.f32 %v3990_v23, %v1329_v60  ;;  %v1913_v5 = vadd.f32 %v1897_v45, %v1861_v52  ;;  %v1238_v9 = vmul.f32 %v1236_v20, %v1235_v57 }
 0x237   : > { %v1912_v4 = vadd.f32 %v1896_v36, %v1860_v51  ;;  %v1339_v11 = vmax.f32 %v1335_v59, 0.0  ;;  %v2001_v14 = vmul.f32 %v4105_v17, %v4177_v56  ;;  %v1586_v15 = vmul.f32 %v4123_v53, %v4073_v62  ;;  %v2681_v36 = vpop.f32.mrb[16].mxu1 }
 0x238   : > { %v1237_v18 = vmul.f32 %v1236_v20, %v1234_v0  ;;  %v1338_v19 = vmax.f32 %v1330_v2, 0.0  ;;  %v1965_v25 = vadd.f32 %v1949_v61, %v1913_v5  ;;  %1241 = vst.msk [vmem:[#allocation2 + $0x99] sm:$0xff] %vm456_vm0, %v1238_v9  ;;  %v1587_v31 = vmul.f32 %v4125_v54, %v4073_v62  ;;  %v1435_v54 = vpop.f32.mrb[17].mxu1 }
 0x239   : > { %v1964_v24 = vadd.f32 %v1948_v46, %v1912_v4  ;;  %v1341_v26 = vmin.f32 %v1339_v11, 6.0  ;;  %v1638_v34 = vmul.f32 %v4127_v55, %v4066_v58  ;;  %v1639_v53 = vmul.f32 %v4121_v48, %v4066_v58 }
 0x23a   : > { %1240 = vst.msk [vmem:[#allocation2 + $0x91] sm:$0xff] %vm456_vm0, %v1237_v18  ;;  %v1340_v20 = vmin.f32 %v1338_v19, 6.0  ;;  %v2017_v6 = vadd.f32 %v2001_v14, %v1965_v25  ;;  %v1690_v37 = vmul.f32 %v4135_v1, %v4075_v63  ;;  %v1441_v39 = vadd.f32 %v2681_v36, %v3990_v23  ;;  %v4237_v19 = vld [vmem:[#allocation2 + $0x48] sm:$0xff]  ;;  %v4241_v25 = vld [vmem:[#allocation2 + $0x52] sm:$0xff] }
 0x23b   : > { %v2016_v35 = vadd.f32 %v2000_v16, %v1964_v24  ;;  %v1344_v38 = vmul.f32 %v1342_v21, %v1341_v26  ;;  %v1654_v40 = vadd.f32 %v1638_v34, %v1586_v15  ;;  %v1655_v43 = vadd.f32 %v1639_v53, %v1587_v31  ;;  %v2686_v57 = vpop.f32.mrb[18].mxu1  ;;  %v4239_v24 = vld [vmem:[#allocation2 + $0x4a] sm:$0xff] }
 0x23c   : > { %v1343_v55 = vmul.f32 %v1342_v21, %v1340_v20  ;;  %v2039_v44 = vadd.f32 %v4196_v27, %v2017_v6  ;;  %v1436_v45 = vadd.f32 %v3990_v23, %v1435_v54  ;;  %v1445_v46 = vmax.f32 %v1441_v39, 0.0  ;;  %v1541_v16 = vpop.f32.mrb[19].mxu1  ;;  %v4247_v53 = vld [vmem:[#allocation2 + $0x50] sm:$0xff] }
 0x23d   : > { %v2038_v48 = vadd.f32 %v4196_v27, %v2016_v35  ;;  %1347 = vst.msk [vmem:[#allocation2 + $0xb1] sm:$0xff] %vm456_vm0, %v1344_v38  ;;  %v1691_v1 = vmul.f32 %v4141_v10, %v4075_v63  ;;  %v1706_v47 = vadd.f32 %v1690_v37, %v1654_v40  ;;  %v1742_v49 = vmul.f32 %v4151_v28, %v4089_v7  ;;  %v4251_v35 = vld [vmem:[#allocation2 + $0x49] sm:$0xff]  ;;  %v4256_v38 = vld [vmem:[#allocation2 + $0x51] sm:$0xff] }
 0x23e   : > { %1346 = vst.msk [vmem:[#allocation2 + $0xa9] sm:$0xff] %vm456_vm0, %v1343_v55  ;;  %v2055_v50 = vmax.f32 %v2039_v44, 0.0  ;;  %v1444_v51 = vmax.f32 %v1436_v45, 0.0  ;;  %v1743_v52 = vmul.f32 %v4153_v29, %v4089_v7  ;;  %v1447_v59 = vmin.f32 %v1445_v46, 6.0 }
 0x23f   : > { %v2054_v21 = vmax.f32 %v2038_v48, 0.0  ;;  %v1707_v60 = vadd.f32 %v1691_v1, %v1655_v43  ;;  %v1758_v61 = vadd.f32 %v1742_v49, %v1706_v47  ;;  %v1794_v10 = vmul.f32 %v4155_v30, %v4085_v3 }
 0x240   : > { %v2071_v2 = vmin.f32 %v2055_v50, 6.0  ;;  %v1446_v5 = vmin.f32 %v1444_v51, 6.0  ;;  %v1795_v9 = vmul.f32 %v4165_v41, %v4085_v3  ;;  %v1450_v11 = vmul.f32 %v1448_v32, %v1447_v59 }
 0x241   : > { %v2070_v0 = vmin.f32 %v2054_v21, 6.0  ;;  %v1759_v14 = vadd.f32 %v1743_v52, %v1707_v60  ;;  %v1810_v15 = vadd.f32 %v1794_v10, %v1758_v61  ;;  %v1846_v18 = vmul.f32 %v4167_v42, %v4091_v8 }
 0x242   : > { %v1449_v31 = vmul.f32 %v1448_v32, %v1446_v5  ;;  %v1847_v34 = vmul.f32 %v4177_v56, %v4091_v8  ;;  %v1898_v20 = vmul.f32 %v4099_v12, %v4237_v19  ;;  %1453 = vst.msk [vmem:[#allocation2 + $0xc9] sm:$0xff] %vm456_vm0, %v1450_v11  ;;  %v1899_v37 = vmul.f32 %v4099_v12, %v4247_v53  ;;  %v4297_v11 = vld [vmem:[#allocation2 + $0x68] sm:$0xff] }
 0x243   : > { %v2723_v26 = vpack.c.bf16 %v2071_v2, %v2070_v0  ;;  %v1811_v6 = vadd.f32 %v1795_v9, %v1759_v14  ;;  %v1862_v36 = vadd.f32 %v1846_v18, %v1810_v15  ;;  %v1950_v32 = vmul.f32 %v4101_v13, %v4251_v35  ;;  %v4290_v0 = vld [vmem:[#allocation2 + $0x60] sm:$0xff] }
 0x244   : > { %1452 = vst.msk [vmem:[#allocation2 + $0xc1] sm:$0xff] %vm456_vm0, %v1449_v31  ;;  %v1951_v39 = vmul.f32 %v4101_v13, %v4256_v38  ;;  %v2002_v54 = vmul.f32 %v4105_v17, %v4239_v24  ;;  %v2003_v40 = vmul.f32 %v4105_v17, %v4241_v25  ;;  %v1547_v43 = vadd.f32 %v2686_v57, %v3990_v23  ;;  %v4299_v14 = vld [vmem:[#allocation2 + $0x61] sm:$0xff] }
 0x245   : > { %2725 = vmatpush3.bf16.xpose.msk.msra.mxu0 %vm4227_vm5, %v2723_v26  ;;  %v1863_v55 = vadd.f32 %v1847_v34, %v1811_v6  ;;  %v1914_v48 = vadd.f32 %v1898_v20, %v1862_v36  ;;  %v1542_v44 = vadd.f32 %v3990_v23, %v1541_v16  ;;  %v1588_v45 = vmul.f32 %v4151_v28, %v4073_v62  ;;  %v4306_v34 = vld [vmem:[#allocation2 + $0x69] sm:$0xff] }
 0x246   : > { %2726 = vmatprep.subr.bf16.mxu0 %v3312_v22  ;;  %v1551_v46 = vmax.f32 %v1547_v43, 0.0  ;;  %v1589_v1 = vmul.f32 %v4153_v29, %v4073_v62  ;;  %v1640_v47 = vmul.f32 %v4155_v30, %v4066_v58  ;;  %v1641_v49 = vmul.f32 %v4165_v41, %v4066_v58 }
 0x247   : > { %v1915_v21 = vadd.f32 %v1899_v37, %v1863_v55  ;;  %v1966_v50 = vadd.f32 %v1950_v32, %v1914_v48  ;;  %v1550_v51 = vmax.f32 %v1542_v44, 0.0  ;;  %v1692_v23 = vmul.f32 %v4167_v42, %v4075_v63  ;;  %v4316_v32 = vld [vmem:[#allocation2 + $0x6a] sm:$0xff] }
 0x248   : > { %v1553_v52 = vmin.f32 %v1551_v46, 6.0  ;;  %v1656_v28 = vadd.f32 %v1640_v47, %v1588_v45  ;;  %v1657_v57 = vadd.f32 %v1641_v49, %v1589_v1  ;;  %v1693_v59 = vmul.f32 %v4177_v56, %v4075_v63 }
 0x249   : > { %v1967_v29 = vadd.f32 %v1951_v39, %v1915_v21  ;;  %v2018_v60 = vadd.f32 %v2002_v54, %v1966_v50  ;;  %v1552_v61 = vmin.f32 %v1550_v51, 6.0  ;;  %v1744_v30 = vmul.f32 %v4237_v19, %v4089_v7 }
 0x24a   : > { %v1556_v41 = vmul.f32 %v1554_v33, %v1553_v52  ;;  %v1708_v10 = vadd.f32 %v1692_v23, %v1656_v28  ;;  %v1709_v16 = vadd.f32 %v1693_v59, %v1657_v57  ;;  %v1745_v42 = vmul.f32 %v4247_v53, %v4089_v7 }
 0x24b   : > { %v2019_v2 = vadd.f32 %v2003_v40, %v1967_v29  ;;  %v2040_v5 = vadd.f32 %v4196_v27, %v2018_v60  ;;  %v1555_v56 = vmul.f32 %v1554_v33, %v1552_v61  ;;  %v1796_v9 = vmul.f32 %v4251_v35, %v4085_v3  ;;  %v4308_v33 = vld [vmem:[#allocation2 + $0x62] sm:$0xff]  ;;  %v4342_v61 = vld [vmem:[#allocation2 + $0x78] sm:$0xff] }
 0x24c   : > { %1559 = vst.msk [vmem:[#allocation2 + $0xe1] sm:$0xff] %vm456_vm0, %v1556_v41  ;;  %v1760_v15 = vadd.f32 %v1744_v30, %v1708_v10  ;;  %v1761_v18 = vadd.f32 %v1745_v42, %v1709_v16  ;;  %v1797_v26 = vmul.f32 %v4256_v38, %v4085_v3  ;;  %v1848_v31 = vmul.f32 %v4239_v24, %v4091_v8  ;;  %v4350_v10 = vld [vmem:[#allocation2 + $0x79] sm:$0xff] }
 0x24d   : > { %v2041_v20 = vadd.f32 %v4196_v27, %v2019_v2  ;;  %v2056_v6 = vmax.f32 %v2040_v5, 0.0  ;;  %1558 = vst.msk [vmem:[#allocation2 + $0xd9] sm:$0xff] %vm456_vm0, %v1555_v56  ;;  %v1849_v36 = vmul.f32 %v4241_v25, %v4091_v8  ;;  %v1900_v37 = vmul.f32 %v4099_v12, %v4290_v0  ;;  %v4358_v5 = vld [vmem:[#allocation2 + $0x81] sm:$0xff] }
 0x24e   : > { %v1812_v39 = vadd.f32 %v1796_v9, %v1760_v15  ;;  %v1813_v54 = vadd.f32 %v1797_v26, %v1761_v18  ;;  %v1901_v40 = vmul.f32 %v4099_v12, %v4297_v11  ;;  %v1952_v43 = vmul.f32 %v4101_v13, %v4299_v14  ;;  %v4360_v56 = vld [vmem:[#allocation2 + $0x7a] sm:$0xff] }
 0x24f   : > { %v2057_v55 = vmax.f32 %v2041_v20, 0.0  ;;  %v2072_v48 = vmin.f32 %v2056_v6, 6.0  ;;  %v1953_v44 = vmul.f32 %v4101_v13, %v4306_v34  ;;  %v2004_v45 = vmul.f32 %v4105_v17, %v4308_v33 }
 0x250   : > { %v1864_v46 = vadd.f32 %v1848_v31, %v1812_v39  ;;  %v1865_v1 = vadd.f32 %v1849_v36, %v1813_v54  ;;  %v2005_v47 = vmul.f32 %v4105_v17, %v4316_v32  ;;  %v1590_v49 = vmul.f32 %v4237_v19, %v4073_v62  ;;  %v4367_v31 = vld [vmem:[#allocation2 + $0x82] sm:$0xff] }
 0x251   : > { %v2073_v21 = vmin.f32 %v2057_v55, 6.0  ;;  %v1591_v50 = vmul.f32 %v4247_v53, %v4073_v62  ;;  %v1642_v51 = vmul.f32 %v4251_v35, %v4066_v58  ;;  %v1643_v23 = vmul.f32 %v4256_v38, %v4066_v58 }
 0x252   : > { %v1916_v52 = vadd.f32 %v1900_v37, %v1864_v46  ;;  %v1917_v28 = vadd.f32 %v1901_v40, %v1865_v1  ;;  %v1694_v57 = vmul.f32 %v4239_v24, %v4075_v63  ;;  %v1695_v59 = vmul.f32 %v4241_v25, %v4075_v63  ;;  %v4348_v24 = vld [vmem:[#allocation2 + $0x80] sm:$0xff] }
 0x253   : > { %v2727_v29 = vpack.c.bf16 %v2073_v21, %v2072_v48  ;;  %v1658_v19 = vadd.f32 %v1642_v51, %v1590_v49  ;;  %v1659_v60 = vadd.f32 %v1643_v23, %v1591_v50  ;;  %v1746_v53 = vmul.f32 %v4290_v0, %v4089_v7 }
 0x254   : > { %v1968_v35 = vadd.f32 %v1952_v43, %v1916_v52  ;;  %v1969_v30 = vadd.f32 %v1953_v44, %v1917_v28  ;;  %v1747_v38 = vmul.f32 %v4297_v11, %v4089_v7  ;;  %v1798_v41 = vmul.f32 %v4299_v14, %v4085_v3 }
 0x255   : > { %2729 = vmatpush3.bf16.xpose.msk.msra.mxu0 %vm4227_vm5, %v2727_v29  ;;  %v1710_v25 = vadd.f32 %v1694_v57, %v1658_v19  ;;  %v1711_v16 = vadd.f32 %v1695_v59, %v1659_v60  ;;  %v1799_v42 = vmul.f32 %v4306_v34, %v4085_v3  ;;  %v1850_v2 = vmul.f32 %v4308_v33, %v4091_v8  ;;  %v4395_v19 = vld [vmem:[#allocation2 + $0x90] sm:$0xff] }
 0x256   : > { %2730 = vmatprep.subr.bf16.mxu0 %v3312_v22  ;;  %v2020_v9 = vadd.f32 %v2004_v45, %v1968_v35  ;;  %v2021_v15 = vadd.f32 %v2005_v47, %v1969_v30  ;;  %v1851_v18 = vmul.f32 %v4316_v32, %v4091_v8  ;;  %v1902_v26 = vmul.f32 %v4099_v12, %v4342_v61  ;;  %v4401_v35 = vld [vmem:[#allocation2 + $0x98] sm:$0xff] }
 0x257   : > { %v1762_v20 = vadd.f32 %v1746_v53, %v1710_v25  ;;  %v1763_v6 = vadd.f32 %v1747_v38, %v1711_v16  ;;  %v1903_v36 = vmul.f32 %v4099_v12, %v4348_v24  ;;  %v1954_v37 = vmul.f32 %v4101_v13, %v4350_v10  ;;  %v4405_v25 = vld [vmem:[#allocation2 + $0x91] sm:$0xff]  ;;  %v4407_v16 = vld [vmem:[#allocation2 + $0x99] sm:$0xff] }
 0x258   : > { %v2042_v39 = vadd.f32 %v4196_v27, %v2020_v9  ;;  %v2043_v54 = vadd.f32 %v4196_v27, %v2021_v15  ;;  %v1955_v40 = vmul.f32 %v4101_v13, %v4358_v5  ;;  %v2006_v43 = vmul.f32 %v4105_v17, %v4360_v56 }
 0x259   : > { %v1814_v55 = vadd.f32 %v1798_v41, %v1762_v20  ;;  %v1815_v48 = vadd.f32 %v1799_v42, %v1763_v6  ;;  %v2007_v44 = vmul.f32 %v4105_v17, %v4367_v31  ;;  %v1592_v45 = vmul.f32 %v4290_v0, %v4073_v62  ;;  %v4409_v42 = vld [vmem:[#allocation2 + $0x92] sm:$0xff] }
 0x25a   : > { %v2058_v46 = vmax.f32 %v2042_v39, 0.0  ;;  %v2059_v1 = vmax.f32 %v2043_v54, 0.0  ;;  %v1593_v47 = vmul.f32 %v4297_v11, %v4073_v62  ;;  %v1644_v49 = vmul.f32 %v4299_v14, %v4066_v58 }
 0x25b   : > { %v1866_v21 = vadd.f32 %v1850_v2, %v1814_v55  ;;  %v1867_v50 = vadd.f32 %v1851_v18, %v1815_v48  ;;  %v1645_v51 = vmul.f32 %v4306_v34, %v4066_v58  ;;  %v1696_v23 = vmul.f32 %v4308_v33, %v4075_v63 }
 0x25c   : > { %v2074_v52 = vmin.f32 %v2058_v46, 6.0  ;;  %v2075_v28 = vmin.f32 %v2059_v1, 6.0  ;;  %v1660_v57 = vadd.f32 %v1644_v49, %v1592_v45  ;;  %v1697_v0 = vmul.f32 %v4316_v32, %v4075_v63 }
 0x25d   : > { %v1918_v59 = vadd.f32 %v1902_v26, %v1866_v21  ;;  %v1919_v29 = vadd.f32 %v1903_v36, %v1867_v50  ;;  %v1661_v11 = vadd.f32 %v1645_v51, %v1593_v47  ;;  %v1748_v14 = vmul.f32 %v4342_v61, %v4089_v7  ;;  %v4419_v26 = vld [vmem:[#allocation2 + $0x9a] sm:$0xff] }
 0x25e   : > { %v2731_v60 = vpack.c.bf16 %v2075_v28, %v2074_v52  ;;  %v1712_v53 = vadd.f32 %v1696_v23, %v1660_v57  ;;  %v1749_v34 = vmul.f32 %v4348_v24, %v4089_v7  ;;  %v1800_v33 = vmul.f32 %v4350_v10, %v4085_v3 }
 0x25f   : > { %v1970_v30 = vadd.f32 %v1954_v37, %v1918_v59  ;;  %v1971_v32 = vadd.f32 %v1955_v40, %v1919_v29  ;;  %v1713_v38 = vadd.f32 %v1697_v0, %v1661_v11  ;;  %v1801_v41 = vmul.f32 %v4358_v5, %v4085_v3 }
 0x260   : > { %2733 = vmatpush3.bf16.xpose.msk.msra.mxu0 %vm4227_vm5, %v2731_v60  ;;  %v1764_v2 = vadd.f32 %v1748_v14, %v1712_v53  ;;  %v1852_v9 = vmul.f32 %v4360_v56, %v4091_v8  ;;  %v1853_v15 = vmul.f32 %v4367_v31, %v4091_v8  ;;  %v1904_v18 = vmul.f32 %v4099_v12, %v4395_v19  ;;  %v4450_v60 = vld [vmem:[#allocation2 + $0xa8] sm:$0xff] }
 0x261   : > { %2734 = vmatprep.subr.bf16.mxu0 %v3312_v22  ;;  %v2022_v20 = vadd.f32 %v2006_v43, %v1970_v30  ;;  %v2023_v6 = vadd.f32 %v2007_v44, %v1971_v32  ;;  %v1765_v36 = vadd.f32 %v1749_v34, %v1713_v38  ;;  %v1905_v37 = vmul.f32 %v4099_v12, %v4401_v35  ;;  %v4456_v30 = vld [vmem:[#allocation2 + $0xa9] sm:$0xff] }
 0x262   : > { %v1816_v39 = vadd.f32 %v1800_v33, %v1764_v2  ;;  %v1956_v54 = vmul.f32 %v4101_v13, %v4405_v25  ;;  %v1957_v40 = vmul.f32 %v4101_v13, %v4407_v16  ;;  %v2008_v55 = vmul.f32 %v4105_v17, %v4409_v42  ;;  %v4454_v33 = vld [vmem:[#allocation2 + $0xb0] sm:$0xff] }
 0x263   : > { %v2044_v48 = vadd.f32 %v4196_v27, %v2022_v20  ;;  %v2045_v45 = vadd.f32 %v4196_v27, %v2023_v6  ;;  %v1817_v43 = vadd.f32 %v1801_v41, %v1765_v36  ;;  %v2009_v44 = vmul.f32 %v4105_v17, %v4419_v26 }
 0x264   : > { %v1868_v46 = vadd.f32 %v1852_v9, %v1816_v39  ;;  %v1594_v1 = vmul.f32 %v4342_v61, %v4073_v62  ;;  %v1595_v47 = vmul.f32 %v4348_v24, %v4073_v62  ;;  %v1646_v49 = vmul.f32 %v4350_v10, %v4066_v58  ;;  %v4462_v9 = vld [vmem:[#allocation2 + $0xb1] sm:$0xff] }
 0x265   : > { %v2060_v21 = vmax.f32 %v2044_v48, 0.0  ;;  %v2061_v50 = vmax.f32 %v2045_v45, 0.0  ;;  %v1869_v51 = vadd.f32 %v1853_v15, %v1817_v43  ;;  %v1647_v23 = vmul.f32 %v4358_v5, %v4066_v58  ;;  %v4464_v15 = vld [vmem:[#allocation2 + $0xaa] sm:$0xff] }
 0x266   : > { %v1920_v52 = vadd.f32 %v1904_v18, %v1868_v46  ;;  %v1662_v28 = vadd.f32 %v1646_v49, %v1594_v1  ;;  %v1698_v57 = vmul.f32 %v4360_v56, %v4075_v63  ;;  %v1699_v61 = vmul.f32 %v4367_v31, %v4075_v63 }
 0x267   : > { %v2076_v0 = vmin.f32 %v2060_v21, 6.0  ;;  %v2077_v59 = vmin.f32 %v2061_v50, 6.0  ;;  %v1921_v24 = vadd.f32 %v1905_v37, %v1869_v51  ;;  %v1663_v29 = vadd.f32 %v1647_v23, %v1595_v47  ;;  %v4472_v37 = vld [vmem:[#allocation2 + $0xb2] sm:$0xff] }
 0x268   : > { %v1972_v11 = vadd.f32 %v1956_v54, %v1920_v52  ;;  %v1714_v10 = vadd.f32 %v1698_v57, %v1662_v28  ;;  %v1750_v14 = vmul.f32 %v4395_v19, %v4089_v7  ;;  %v1751_v5 = vmul.f32 %v4401_v35, %v4089_v7 }
 0x269   : > { %v2735_v53 = vpack.c.bf16 %v2077_v59, %v2076_v0  ;;  %v1973_v34 = vadd.f32 %v1957_v40, %v1921_v24  ;;  %v1715_v56 = vadd.f32 %v1699_v61, %v1663_v29  ;;  %v1802_v31 = vmul.f32 %v4405_v25, %v4085_v3 }
 0x26a   : > { %v2024_v32 = vadd.f32 %v2008_v55, %v1972_v11  ;;  %v1766_v38 = vadd.f32 %v1750_v14, %v1714_v10  ;;  %v1803_v41 = vmul.f32 %v4407_v16, %v4085_v3  ;;  %v1854_v2 = vmul.f32 %v4409_v42, %v4091_v8  ;;  %v1888_v10 = vld [vmem:[#allocation2 + $0xc0] sm:$0xff] }
 0x26b   : > { %2737 = vmatpush3.bf16.xpose.msk.msra.mxu0 %vm4227_vm5, %v2735_v53  ;;  %v2025_v18 = vadd.f32 %v2009_v44, %v1973_v34  ;;  %v1767_v20 = vadd.f32 %v1751_v5, %v1715_v56  ;;  %v1855_v6 = vmul.f32 %v4419_v26, %v4091_v8  ;;  %v1906_v36 = vmul.f32 %v4099_v12, %v4450_v60  ;;  %v1889_v53 = vld [vmem:[#allocation2 + $0xc8] sm:$0xff] }
 0x26c   : > { %2738 = vmatprep.subr.bf16.mxu0 %v3312_v22  ;;  %v2046_v39 = vadd.f32 %v4196_v27, %v2024_v32  ;;  %v1818_v54 = vadd.f32 %v1802_v31, %v1766_v38  ;;  %v1907_v40 = vmul.f32 %v4099_v12, %v4454_v33  ;;  %v1958_v55 = vmul.f32 %v4101_v13, %v4456_v30  ;;  %v1940_v34 = vld [vmem:[#allocation2 + $0xc1] sm:$0xff]  ;;  %v1941_v38 = vld [vmem:[#allocation2 + $0xc9] sm:$0xff] }
 0x26d   : > { %v2047_v48 = vadd.f32 %v4196_v27, %v2025_v18  ;;  %v1819_v45 = vadd.f32 %v1803_v41, %v1767_v20  ;;  %v1959_v43 = vmul.f32 %v4101_v13, %v4462_v9  ;;  %v2010_v44 = vmul.f32 %v4105_v17, %v4464_v15  ;;  %v1992_v41 = vld [vmem:[#allocation2 + $0xc2] sm:$0xff] }
 0x26e   : > { %v2062_v46 = vmax.f32 %v2046_v39, 0.0  ;;  %v1870_v1 = vadd.f32 %v1854_v2, %v1818_v54  ;;  %v2011_v47 = vmul.f32 %v4105_v17, %v4472_v37  ;;  %v1596_v49 = vmul.f32 %v4395_v19, %v4073_v62 }
 0x26f   : > { %v2063_v21 = vmax.f32 %v2047_v48, 0.0  ;;  %v1871_v50 = vadd.f32 %v1855_v6, %v1819_v45  ;;  %v1597_v51 = vmul.f32 %v4401_v35, %v4073_v62  ;;  %v1648_v23 = vmul.f32 %v4405_v25, %v4066_v58 }
 0x270   : > { %v2078_v52 = vmin.f32 %v2062_v46, 6.0  ;;  %v1922_v28 = vadd.f32 %v1906_v36, %v1870_v1  ;;  %v1649_v57 = vmul.f32 %v4407_v16, %v4066_v58  ;;  %v1700_v61 = vmul.f32 %v4409_v42, %v4075_v63  ;;  %v1993_v36 = vld [vmem:[#allocation2 + $0xca] sm:$0xff] }
 0x271   : > { %v2079_v0 = vmin.f32 %v2063_v21, 6.0  ;;  %v1923_v59 = vadd.f32 %v1907_v40, %v1871_v50  ;;  %v1664_v24 = vadd.f32 %v1648_v23, %v1596_v49  ;;  %v1701_v19 = vmul.f32 %v4419_v26, %v4075_v63 }
 0x272   : > { %v1974_v29 = vadd.f32 %v1958_v55, %v1922_v28  ;;  %v1665_v11 = vadd.f32 %v1649_v57, %v1597_v51  ;;  %v1752_v35 = vmul.f32 %v4450_v60, %v4089_v7  ;;  %v1753_v25 = vmul.f32 %v4454_v33, %v4089_v7 }
 0x273   : > { %v2739_v14 = vpack.c.bf16 %v2079_v0, %v2078_v52  ;;  %v1975_v16 = vadd.f32 %v1959_v43, %v1923_v59  ;;  %v1716_v5 = vadd.f32 %v1700_v61, %v1664_v24  ;;  %v1804_v42 = vmul.f32 %v4456_v30, %v4085_v3 }
 0x274   : > { %v2026_v56 = vadd.f32 %v2010_v44, %v1974_v29  ;;  %v1717_v31 = vadd.f32 %v1701_v19, %v1665_v11  ;;  %v1805_v26 = vmul.f32 %v4462_v9, %v4085_v3  ;;  %v1856_v32 = vmul.f32 %v4464_v15, %v4091_v8 }
 0x275   : > { %2741 = vmatpush3.bf16.xpose.msk.msra.mxu0 %vm4227_vm5, %v2739_v14  ;;  %v2027_v2 = vadd.f32 %v2011_v47, %v1975_v16  ;;  %v1768_v18 = vadd.f32 %v1752_v35, %v1716_v5  ;;  %v1857_v20 = vmul.f32 %v4472_v37, %v4091_v8  ;;  %v1908_v6 = vmul.f32 %v4099_v12, %v1888_v10  ;;  %v1890_v14 = vld [vmem:[#allocation2 + $0xd8] sm:$0xff] }
 0x276   : > { %2742 = vmatprep.subr.bf16.mxu0 %v3312_v22  ;;  %v2048_v39 = vadd.f32 %v4196_v27, %v2026_v56  ;;  %v1769_v54 = vadd.f32 %v1753_v25, %v1717_v31  ;;  %v1909_v40 = vmul.f32 %v4099_v12, %v1889_v53  ;;  %v1960_v55 = vmul.f32 %v4101_v13, %v1940_v34  ;;  %v1943_v31 = vld [vmem:[#allocation2 + $0xe1] sm:$0xff] }
 0x277   : > { %v2049_v48 = vadd.f32 %v4196_v27, %v2027_v2  ;;  %v1820_v45 = vadd.f32 %v1804_v42, %v1768_v18  ;;  %v1961_v43 = vmul.f32 %v4101_v13, %v1941_v38  ;;  %v2012_v44 = vmul.f32 %v4105_v17, %v1992_v41 }
 0x278   : > { %v2064_v46 = vmax.f32 %v2048_v39, 0.0  ;;  %v1821_v1 = vadd.f32 %v1805_v26, %v1769_v54  ;;  %v2013_v47 = vmul.f32 %v4105_v17, %v1993_v36  ;;  %v1598_v49 = vmul.f32 %v4450_v60, %v4073_v62 }
 0x279   : > { %v2065_v21 = vmax.f32 %v2049_v48, 0.0  ;;  %v1872_v50 = vadd.f32 %v1856_v32, %v1820_v45  ;;  %v1599_v51 = vmul.f32 %v4454_v33, %v4073_v62  ;;  %v1650_v23 = vmul.f32 %v4456_v30, %v4066_v58 }
 0x27a   : > { %v2080_v52 = vmin.f32 %v2064_v46, 6.0  ;;  %v1873_v28 = vadd.f32 %v1857_v20, %v1821_v1  ;;  %v1651_v57 = vmul.f32 %v4462_v9, %v4066_v58  ;;  %v1702_v61 = vmul.f32 %v4464_v15, %v4075_v63 }
 0x27b   : > { %v2081_v0 = vmin.f32 %v2065_v21, 6.0  ;;  %v1924_v59 = vadd.f32 %v1908_v6, %v1872_v50  ;;  %v1666_v24 = vadd.f32 %v1650_v23, %v1598_v49  ;;  %v1703_v60 = vmul.f32 %v4472_v37, %v4075_v63  ;;  %v1995_v6 = vld [vmem:[#allocation2 + $0xe2] sm:$0xff] }
 0x27c   : > { %v1925_v19 = vadd.f32 %v1909_v40, %v1873_v28  ;;  %v1667_v29 = vadd.f32 %v1651_v57, %v1599_v51  ;;  %v1754_v62 = vmul.f32 %v1888_v10, %v4089_v7  ;;  %v1755_v33 = vmul.f32 %v1889_v53, %v4089_v7  ;;  %v1891_v10 = vld [vmem:[#allocation2 + $0xe0] sm:$0xff]  ;;  %v2214_v57 = vld [vmem:[%s3735_s25] sm:$0xf]  ;;  %s3159_s25 = scalar_lea.vmem %s4569_s26, 64 }
 0x27d   : > { %v2743_v30 = vpack.c.bf16 %v2081_v0, %v2080_v52  ;;  %v1976_v11 = vadd.f32 %v1960_v55, %v1924_v59  ;;  %v1718_v35 = vadd.f32 %v1702_v61, %v1666_v24  ;;  %v1806_v58 = vmul.f32 %v1940_v34, %v4085_v3  ;;  %v1942_v53 = vld [vmem:[#allocation2 + $0xd9] sm:$0xff]  ;;  %v2086_v52 = vld [vmem:[#allocation12] sm:$0xf]  ;;  %p3160_p8 = scmp.ne.s32.totalorder %s4569_s26, %s3159_s25  ;;  %p3167_p11 = scmp.lt.s32.totalorder %s3165_s24, %s3159_s25 }
 0x27e   : > { %v1977_v9 = vadd.f32 %v1961_v43, %v1925_v19  ;;  %v1719_v25 = vadd.f32 %v1703_v60, %v1667_v29  ;;  %v1807_v15 = vmul.f32 %v1941_v38, %v4085_v3  ;;  %v1858_v16 = vmul.f32 %v1992_v41, %v4091_v8  ;;  %v1994_v41 = vld [vmem:[#allocation2 + $0xda] sm:$0xff] }
 0x27f   : > { %2745 = vmatpush3.bf16.xpose.msk.msra.mxu0 %vm4227_vm5, %v2743_v30  ;;  %v2028_v63 = vadd.f32 %v2012_v44, %v1976_v11  ;;  %v1770_v37 = vadd.f32 %v1754_v62, %v1718_v35  ;;  %v1859_v42 = vmul.f32 %v1993_v36, %v4091_v8  ;;  %v1910_v3 = vmul.f32 %v4099_v12, %v1890_v14  ;;  %p3161_p13 = pnand %p3160_p8, %p4714_p3  ;;  %p3168_p5 = por %p3167_p11, %p3166_p1 }
 0x280   : > { %2746 = vmatprep.subr.bf16.mxu0 %v3312_v22  ;;  %v2029_v7 = vadd.f32 %v2013_v47, %v1977_v9  ;;  %v1771_v5 = vadd.f32 %v1755_v33, %v1719_v25  ;;  %v1911_v38 = vmul.f32 %v4099_v12, %v1891_v10  ;;  %v1962_v20 = vmul.f32 %v4101_v13, %v1942_v53 }
 0x281   : > { %v2050_v34 = vadd.f32 %v4196_v27, %v2028_v63  ;;  %v1822_v56 = vadd.f32 %v1806_v58, %v1770_v37  ;;  %v1963_v36 = vmul.f32 %v4101_v13, %v1943_v31  ;;  %v2014_v55 = vmul.f32 %v4105_v17, %v1994_v41  ;;  %p3162_p10 = pneg %p3161_p13 }
 0x282   : > { %v2051_v26 = vadd.f32 %v4196_v27, %v2029_v7  ;;  %v1823_v32 = vadd.f32 %v1807_v15, %v1771_v5  ;;  %v2015_v43 = vmul.f32 %v4105_v17, %v1995_v6 }
 0x283   : > { %v2066_v2 = vmax.f32 %v2050_v34, 0.0  ;;  %v1874_v18 = vadd.f32 %v1858_v16, %v1822_v56  ;;  %p3169_p6 = pnand %p3168_p5, %p3162_p10 }
 0x284   : > { %v2067_v39 = vmax.f32 %v2051_v26, 0.0  ;;  %v1875_v8 = vadd.f32 %v1859_v42, %v1823_v32 }
 0x285   : > { %v2082_v54 = vmin.f32 %v2066_v2, 6.0  ;;  %v1926_v40 = vadd.f32 %v1910_v3, %v1874_v18 }
 0x286   : > { %v2083_v48 = vmin.f32 %v2067_v39, 6.0  ;;  %v1927_v45 = vadd.f32 %v1911_v38, %v1875_v8 }
 0x287   : > { %v1978_v44 = vadd.f32 %v1962_v20, %v1926_v40 }
 0x288   : > { %v2747_v12 = vpack.c.bf16 %v2083_v48, %v2082_v54  ;;  %v1979_v46 = vadd.f32 %v1963_v36, %v1927_v45 }
 0x289   : > { %v2030_v1 = vadd.f32 %v2014_v55, %v1978_v44 }
 0x28a   : > { %2749 = vmatpush3.bf16.xpose.msk.msra.mxu0 %vm4227_vm5, %v2747_v12  ;;  %v2031_v47 = vadd.f32 %v2015_v43, %v1979_v46 }
 0x28b   : > { %2750 = vmatprep.subr.bf16.mxu0 %v3312_v22  ;;  %v2052_v13 = vadd.f32 %v4196_v27, %v2030_v1  ;;  %v2091_v22 = vpop.permute.xlu0 %2090 }
 0x28c   : > { %v2053_v49 = vadd.f32 %v4196_v27, %v2031_v47 }
 0x28d   : > { %v2068_v21 = vmax.f32 %v2052_v13, 0.0 }
 0x28e   : > { %v2069_v17 = vmax.f32 %v2053_v49, 0.0 }
 0x28f   : > { %v2084_v50 = vmin.f32 %v2068_v21, 6.0 }
 0x290   : > { %v2085_v51 = vmin.f32 %v2069_v17, 6.0 }
 0x292   : > { %v2751_v23 = vpack.c.bf16 %v2085_v51, %v2084_v50 }
 0x294   : > { %2753 = vmatpush3.bf16.xpose.msk.msra.mxu0 %vm4227_vm5, %v2751_v23 }
 0x29b   : > { %2720 = vmatmul.mubr.msk.f32.vlgmr.msra.gmra.mrb[0].mxu0 %vm456_vm0, %v2086_v52 }
 0x36e   : > { %v2210_v28 = vpop.f32.mrb[0].mxu0 }
 0x36f   : > { %v2211_v27 = vadd.f32 %v2210_v28, %v2091_v22  ;;  %v2721_v61 = vpop.f32.mrb[1].mxu0 }
 0x371   : > { %v2215_v0 = vadd.f32 %v2214_v57, %v2211_v27 }
 0x373   : > { %2216 = vst [vmem:[%s455_s23] sm:$0xf] %v2215_v0 }
 0x374   : > { %3172 = shalt.err (!%p3169_p6)
}
 0x375   : > { %s3173_s5 = scalar_lea.hbm %s4567_s12, 64  ;;  %s3177_s17 = scalar_lea.hbm %s4713_s1, 256 }
 0x376   : > { %p3174_p2 = scmp.ne.s32.totalorder %s4567_s12, %s3173_s5  ;;  %p3178_p9 = scmp.lt.u32.totalorder %s4567_s12, %s4713_s1 }
 0x377   : > { %p3179_p0 = scmp.lt.u32.totalorder %s3177_s17, %s3173_s5  ;;  %p3181_p8 = scmp.lt.u32.totalorder %s3173_s5, %s4567_s12 }
 0x378   : > { %p3175_p4 = pnand %p3174_p2, %p4714_p3 }
 0x379   : > { %p3180_p12 = por %p3179_p0, %p3178_p9 }
 0x37a   : > { %p3176_p7 = pneg %p3175_p4 }
 0x37b   : > { %p3182_p13 = por %p3181_p8, %p3180_p12 }
 0x37d   : > { %p3183_p10 = pnand %p3182_p13, %p3176_p7 }
 0x37f   : > { %3186 = shalt.err (!%p3183_p10)
}
 0x380   : > { %2782 = dma.vmem_to_hbm [thread:$0]  (%p4714_p3), %s4569_s26, 64, %s4567_s12, %s2218_s0  }
 0x381 PF: > { %s4715_s3 = sld [smem:[#allocation29_spill]]  ;;  %p2827_p1 = scmp.ge.s32.totalorder %s3297_s15, 2 }
 0x382   : > { %s2245_s16 = sand.u32 1, %s3257_s27  }
 0x383   : > { %s2246_s23 = scalar_lea.sflag [#allocation5], %s2245_s16 }
 0x387   : > { %p4716_p11 = scmp.ne.s32.totalorder %s4715_s3, 0 }
 0x389   : > { %p2811_p5 = pnand %p2827_p1, %p4716_p11 }
 0x38b   : > { %3252 = dma.done.wait (!%p2811_p5), %s2246_s23, 64  }
 0x38c   : > { %3254 = vsyncadd (!%p2811_p5), %s2246_s23, 4294967232  ;;  %s30_s15 = sadd.s32 1, %s3297_s15   ;;  %s4717_s20 = sld [smem:[#allocation27_spill]] }
 0x38d   : > { %p27_p6 = scmp.ge.s32.totalorder %s30_s15, 6   ;;  %s4718_s26 = sld [smem:[#allocation28_spill]] }
 0x38e   : > { %s4719_s27 = smov %s3261_s28  ;;  %s4720_s28 = smov %s3265_s29 }
 0x38f   : > { %s4721_s29 = smov %s3663_s11  ;;  %s4722_s30 = smov %s3273_s9 }
 0x390   : > { %s4723_s9 = smov %s3277_s10  ;;  %s4724_s10 = smov %s3660_s22 }
 0x391   : > { %s4725_s11 = smov %s3289_s13  ;;  %s4726_s12 = smov %s3293_s14 }
 0x392   : > { %s4727_s13 = smov %s4717_s20  ;;  %29 = sbr.rel (!%p27_p6) target bundleno = 24 (0x18), region = 153 }
 0x393   : > { %s4728_s14 = smov %s4718_s26 }
 0x399   :  { %2251 = vsyncpa [#allocation4], 1 }
 0x39a   :  { %2253 = vsyncpa [#allocation4 + $0x1], 1 }
 0x39b   :  { %2254 = vsyncpa [#allocation7], 1 }
 0x39c   :  { %2255 = vsyncpa [#allocation10], 1 }
 0x39d   :  { %2256 = vsyncpa [#allocation13], 1 }
 0x39e   :  { %2257 = vsyncpa [#allocation16], 1 }
 0x39f   :  { %2259 = vsyncpa [#allocation16 + $0x1], 1 }
 0x3a0   :  { %2260 = vsyncpa [#allocation5], 1 }
 0x3a1   :  { %2262 = vsyncpa [#allocation5 + $0x1], 1 }

</bundles_post_ra>
